<compile_context>
chip_gen: v5e
topology: v5e:2x2
jax: 0.10.0
libtpu: 0.0.40
codegen_flags: <defaults>
</compile_context>

<pallas_src>
import jax
import jax.numpy as jnp
from jax.experimental import pallas as pl
from jax.experimental.pallas import tpu as pltpu

NUM_HEADS = 8
NUM_LAYERS = 6
LN_EPS = 1e-5
LANE = 128  # lane-dense padding for the classifier output


# ---------------------------------------------------------------------------
# Fused kernel: all encoder layers + classifier, one batch block per grid row.
# ---------------------------------------------------------------------------
def _fused_model_kernel(x_ref, bias_ref,
                        wqkv_ref, bqkv_ref, wo_ref, bo_ref,
                        w1_ref, b1_ref, w2_ref, b2_ref,
                        g1_ref, be1_ref, g2_ref, be2_ref,
                        clsw_ref, clsb_ref,
                        o_ref,
                        act_ref):
    layer = pl.program_id(1)
    bb, S, D = x_ref.shape
    H = NUM_HEADS
    hd = D // H
    R = bb * S

    # First layer step of each batch block: load embeddings into the resident
    # (Bb*S, D) f32 residual-stream scratch (stays in VMEM across all layers).
    @pl.when(layer == 0)
    def _():
        act_ref[...] = x_ref[...].reshape(R, D)

    x = act_ref[...]                                        # (R, D) f32

    # --- packed QKV projection: one (R, D) @ (D, 3D) matmul, bf16 MXU / f32 acc
    #     (1/sqrt(hd) is pre-folded into the Q columns by the wrapper).
    xb = x.astype(jnp.bfloat16)
    qkv = (jnp.dot(xb, wqkv_ref[0], preferred_element_type=jnp.float32)
           + bqkv_ref[0])                                   # (R, 3D) f32
    qkv3 = qkv.reshape(bb, S, 3 * D)                        # (bb, S, 3D)

    # key-padding mask as additive key bias, loaded once; (bb,1,S) broadcasts
    # along the sublane (query) dim for free on the VPU.
    kbias = bias_ref[...]                                   # (bb, 1, S) f32

    # --- multi-head attention: each head's output is folded straight through
    # its W_o row-slab into an f32 accumulator -> no head scratch, no narrow
    # masked lane stores.
    attn = jnp.zeros((R, D), jnp.float32)
    for h in range(H):
        q = qkv3[:, :, h * hd:(h + 1) * hd]                 # (bb, S, hd)
        k = qkv3[:, :, D + h * hd:D + (h + 1) * hd]
        v = qkv3[:, :, 2 * D + h * hd:2 * D + (h + 1) * hd]
        s = jnp.einsum('bqd,bkd->bqk', q, k,
                       preferred_element_type=jnp.float32)  # (bb, S, S)
        s = s + kbias                                       # mask padded keys
        s = s - jnp.max(s, axis=-1, keepdims=True)
        e = jnp.exp(s)
        p = e * pl.reciprocal(jnp.sum(e, axis=-1, keepdims=True), approx=True)
        o = jnp.einsum('bqk,bkd->bqd', p, v,
                       preferred_element_type=jnp.float32)  # (bb, S, hd)
        attn = attn + jnp.dot(
            o.reshape(R, hd).astype(jnp.bfloat16),
            wo_ref[0, h * hd:(h + 1) * hd, :],              # cheap sublane slab
            preferred_element_type=jnp.float32)
    attn = attn + bo_ref[0]

    # --- residual + LayerNorm1 (post-norm, f32 statistics)
    h1 = x + attn
    mu = jnp.mean(h1, axis=-1, keepdims=True)
    var = jnp.mean(jnp.square(h1 - mu), axis=-1, keepdims=True)
    h1 = (h1 - mu) * jax.lax.rsqrt(var + LN_EPS) * g1_ref[0] + be1_ref[0]

    # --- feed-forward: Linear -> ReLU -> Linear (bf16 MXU / f32 acc)
    f = (jnp.dot(h1.astype(jnp.bfloat16), w1_ref[0],
                 preferred_element_type=jnp.float32) + b1_ref[0])
    f = jnp.maximum(f, 0.0)
    f = (jnp.dot(f.astype(jnp.bfloat16), w2_ref[0],
                 preferred_element_type=jnp.float32) + b2_ref[0])

    # --- residual + LayerNorm2
    h2 = h1 + f
    mu2 = jnp.mean(h2, axis=-1, keepdims=True)
    var2 = jnp.mean(jnp.square(h2 - mu2), axis=-1, keepdims=True)
    out = (h2 - mu2) * jax.lax.rsqrt(var2 + LN_EPS) * g2_ref[0] + be2_ref[0]

    act_ref[...] = out                                      # carry to next layer

    # --- last layer: fused classifier, lane-dense (128-padded) output
    @pl.when(layer == pl.num_programs(1) - 1)
    def _():
        logits = (jnp.dot(out.astype(jnp.bfloat16), clsw_ref[...],
                          preferred_element_type=jnp.float32) + clsb_ref[...])
        o_ref[...] = logits.reshape(o_ref.shape)


# ---------------------------------------------------------------------------
# Parameters (deterministic synthetic init; shapes follow the nn.Module,
# layer weights stacked along a leading num_layers axis for streaming).
# ---------------------------------------------------------------------------
def init_params(key, vocab_size, D, num_labels, num_layers=NUM_LAYERS):
    ks = jax.random.split(key, 8)
    s = 0.02
    return {
        "tok_emb": s * jax.random.normal(ks[0], (vocab_size, D), jnp.float32),
        "pos_emb": s * jax.random.normal(ks[1], (512, D), jnp.float32),
        "wqkv": s * jax.random.normal(ks[2], (num_layers, D, 3 * D), jnp.float32),
        "bqkv": jnp.zeros((num_layers, 1, 3 * D), jnp.float32),
        "wo": s * jax.random.normal(ks[3], (num_layers, D, D), jnp.float32),
        "bo": jnp.zeros((num_layers, 1, D), jnp.float32),
        "w1": s * jax.random.normal(ks[4], (num_layers, D, 4 * D), jnp.float32),
        "b1": jnp.zeros((num_layers, 1, 4 * D), jnp.float32),
        "w2": s * jax.random.normal(ks[5], (num_layers, 4 * D, D), jnp.float32),
        "b2": jnp.zeros((num_layers, 1, D), jnp.float32),
        "g1": jnp.ones((num_layers, 1, D), jnp.float32),
        "be1": jnp.zeros((num_layers, 1, D), jnp.float32),
        "g2": jnp.ones((num_layers, 1, D), jnp.float32),
        "be2": jnp.zeros((num_layers, 1, D), jnp.float32),
        "cls_w": s * jax.random.normal(ks[6], (D, num_labels), jnp.float32),
        "cls_b": jnp.zeros((1, num_labels), jnp.float32),
    }


def _pick_batch_block(B, S, target_rows=512):
    """Largest divisor of B with bb*S <= target_rows, while keeping >= 2 batch
    blocks (so the 'parallel' batch axis feeds both v7x TensorCores)."""
    bb = 1
    for c in range(1, B + 1):
        if B % c != 0 or c * S > target_rows:
            continue
        if B >= 2 and B // c < 2:
            continue
        bb = c
    return bb


def _pick_vmem_limit(default=48 * 1024 * 1024):
    """Scoped-VMEM budget ~80% of the chip's physical VMEM (v5e/v6e: 128 MiB,
    v7x: 64 MiB), with a conservative fallback that fits every chip."""
    try:
        info = pltpu.get_tpu_info()
        cap = getattr(info, "vmem_capacity_bytes", None)
        if cap is None:
            return default
        return int(cap * 0.8)
    except Exception:
        return default


# ---------------------------------------------------------------------------
# Full forward pass.
# ---------------------------------------------------------------------------
def model_forward(params, input_ids, attention_mask):
    B, S = input_ids.shape
    D = params["tok_emb"].shape[1]
    num_labels = params["cls_w"].shape[1]
    Lp = ((num_labels + LANE - 1) // LANE) * LANE

    # embedding + positional embedding (data-dependent gather; plain JAX glue)
    x = (params["tok_emb"][input_ids]
         + params["pos_emb"][:S][None, :, :]).astype(jnp.float32)

    # PyTorch: key_padding_mask = ~attention_mask.bool() (True = pad);
    # encoded as an additive key bias: 0 for real tokens, -1e30 for pads.
    key_bias = jnp.where(attention_mask > 0, 0.0, -1e30).astype(jnp.float32)
    key_bias = key_bias.reshape(B, 1, S)

    bb = _pick_batch_block(B, S)
    grid = (B // bb, NUM_LAYERS)

    bf16 = jnp.bfloat16
    # Fold the 1/sqrt(head_dim) attention scale into the Q columns of the QKV
    # projection — free (done once at the bf16 weight cast).
    scale = 1.0 / float(D // NUM_HEADS) ** 0.5
    wqkv = params["wqkv"].at[:, :, :D].multiply(scale)
    bqkv = params["bqkv"].at[:, :, :D].multiply(scale)

    layer_ws = [
        wqkv.astype(bf16), bqkv,
        params["wo"].astype(bf16), params["bo"],
        params["w1"].astype(bf16), params["b1"],
        params["w2"].astype(bf16), params["b2"],
        params["g1"], params["be1"], params["g2"], params["be2"],
    ]
    # lane-dense (128-padded) classifier weights
    cls_w = jnp.zeros((D, Lp), bf16).at[:, :num_labels].set(
        params["cls_w"].astype(bf16))
    cls_b = jnp.zeros((1, Lp), jnp.float32).at[:, :num_labels].set(
        params["cls_b"])

    def lspec(a):  # per-layer weight slab streamed along the layer grid axis
        return pl.BlockSpec((1,) + a.shape[1:], lambda b, l: (l, 0, 0))

    def fspec(a):  # layer-invariant full block (classifier)
        return pl.BlockSpec(a.shape, lambda b, l: (0, 0))

    logits = pl.pallas_call(
        _fused_model_kernel,
        out_shape=jax.ShapeDtypeStruct((B, S, Lp), jnp.float32),
        grid=grid,
        in_specs=([pl.BlockSpec((bb, S, D), lambda b, l: (b, 0, 0)),
                   pl.BlockSpec((bb, 1, S), lambda b, l: (b, 0, 0))]
                  + [lspec(a) for a in layer_ws]
                  + [fspec(cls_w), fspec(cls_b)]),
        out_specs=pl.BlockSpec((bb, S, Lp), lambda b, l: (b, 0, 0)),
        scratch_shapes=[pltpu.VMEM((bb * S, D), jnp.float32)],  # residual stream
        compiler_params=pltpu.CompilerParams(
            dimension_semantics=("parallel", "arbitrary"),
            vmem_limit_bytes=_pick_vmem_limit()),
    )(x, key_bias, *layer_ws, cls_w, cls_b)

    return logits[:, :, :num_labels]


if __name__ == "__main__":
    vocab_size, embedding_dim, num_labels = 50, 32, 5
    B, S = 2, 8

    key = jax.random.PRNGKey(0)
    kp, kid = jax.random.split(key)
    params = init_params(kp, vocab_size, embedding_dim, num_labels)

    input_ids = jax.random.randint(kid, (B, S), 0, vocab_size, dtype=jnp.int32)
    # batch 0: no padding; batch 1: last two tokens padded
    attention_mask = jnp.array([[1] * S, [1] * (S - 2) + [0, 0]], dtype=jnp.int32)

    fwd = jax.jit(model_forward)
    logits = fwd(params, input_ids, attention_mask)
    jax.block_until_ready(logits)

    assert logits.shape == (B, S, num_labels)
    assert bool(jnp.all(jnp.isfinite(logits)))
    print("KERNEL_OK")
</pallas_src>

<mosaic_0001>
module attributes {stable_mosaic.version = 11 : i64} {
  func.func @_fused_model_kernel(%arg0: i32, %arg1: i32, %arg2: memref<1x8x32xf32, #tpu.memory_space<vmem>>, %arg3: memref<1x1x8xf32, #tpu.memory_space<vmem>>, %arg4: memref<1x32x96xbf16, #tpu.memory_space<vmem>>, %arg5: memref<1x1x96xf32, #tpu.memory_space<vmem>>, %arg6: memref<1x32x32xbf16, #tpu.memory_space<vmem>>, %arg7: memref<1x1x32xf32, #tpu.memory_space<vmem>>, %arg8: memref<1x32x128xbf16, #tpu.memory_space<vmem>>, %arg9: memref<1x1x128xf32, #tpu.memory_space<vmem>>, %arg10: memref<1x128x32xbf16, #tpu.memory_space<vmem>>, %arg11: memref<1x1x32xf32, #tpu.memory_space<vmem>>, %arg12: memref<1x1x32xf32, #tpu.memory_space<vmem>>, %arg13: memref<1x1x32xf32, #tpu.memory_space<vmem>>, %arg14: memref<1x1x32xf32, #tpu.memory_space<vmem>>, %arg15: memref<1x1x32xf32, #tpu.memory_space<vmem>>, %arg16: memref<32x128xbf16, #tpu.memory_space<vmem>>, %arg17: memref<1x128xf32, #tpu.memory_space<vmem>>, %arg18: memref<1x8x128xf32, #tpu.memory_space<vmem>>, %arg19: memref<8x32xf32, #tpu.memory_space<vmem>>) attributes {dimension_semantics = [#tpu.dimension_semantics<parallel>, #tpu.dimension_semantics<arbitrary>], iteration_bounds = array<i64: 2, 6>, scalar_prefetch = 0 : i64, scratch_operands = 1 : i64, tpu.core_type = #tpu.core_type<tc>, window_params = [{transform_indices = @transform_0, window_bounds = array<i64: 1, 8, 32>}, {transform_indices = @transform_1, window_bounds = array<i64: 1, 1, 8>}, {transform_indices = @transform_2, window_bounds = array<i64: 1, 32, 96>}, {transform_indices = @transform_3, window_bounds = array<i64: 1, 1, 96>}, {transform_indices = @transform_4, window_bounds = array<i64: 1, 32, 32>}, {transform_indices = @transform_5, window_bounds = array<i64: 1, 1, 32>}, {transform_indices = @transform_6, window_bounds = array<i64: 1, 32, 128>}, {transform_indices = @transform_7, window_bounds = array<i64: 1, 1, 128>}, {transform_indices = @transform_8, window_bounds = array<i64: 1, 128, 32>}, {transform_indices = @transform_9, window_bounds = array<i64: 1, 1, 32>}, {transform_indices = @transform_10, window_bounds = array<i64: 1, 1, 32>}, {transform_indices = @transform_11, window_bounds = array<i64: 1, 1, 32>}, {transform_indices = @transform_12, window_bounds = array<i64: 1, 1, 32>}, {transform_indices = @transform_13, window_bounds = array<i64: 1, 1, 32>}, {pipeline_mode = #tpu.pipeline_mode<synchronous>, transform_indices = @transform_14, window_bounds = array<i64: 32, 128>}, {pipeline_mode = #tpu.pipeline_mode<synchronous>, transform_indices = @transform_15, window_bounds = array<i64: 1, 128>}, {transform_indices = @transform_16, window_bounds = array<i64: 1, 8, 128>}]} {
    %c0_i32 = arith.constant 0 : i32
    %0 = arith.cmpi eq, %arg1, %c0_i32 : i32
    %1 = arith.extui %0 : i1 to i32
    %c0_i32_0 = arith.constant 0 : i32
    %2 = arith.cmpi ne, %1, %c0_i32_0 : i32
    scf.if %2 {
      %c0_112 = arith.constant 0 : index
      %c0_113 = arith.constant 0 : index
      %c0_114 = arith.constant 0 : index
      %279 = vector.load %arg2[%c0_112, %c0_113, %c0_114] : memref<1x8x32xf32, #tpu.memory_space<vmem>>, vector<1x8x32xf32>
      %280 = vector.shape_cast %279 : vector<1x8x32xf32> to vector<8x32xf32>
      %c0_115 = arith.constant 0 : index
      %c0_116 = arith.constant 0 : index
      %281 = vector.load %arg19[%c0_115, %c0_116] : memref<8x32xf32, #tpu.memory_space<vmem>>, vector<8x32xf32>
      tpu.vector_store %arg19[%c0_115, %c0_116], %280 {strides = array<i32>} : memref<8x32xf32, #tpu.memory_space<vmem>>, vector<8x32xf32>,
    } else {
    }
    %c0 = arith.constant 0 : index
    %c0_1 = arith.constant 0 : index
    %3 = vector.load %arg19[%c0, %c0_1] : memref<8x32xf32, #tpu.memory_space<vmem>>, vector<8x32xf32>
    %4 = arith.truncf %3 : vector<8x32xf32> to vector<8x32xbf16>
    %c0_2 = arith.constant 0 : index
    %c0_3 = arith.constant 0 : index
    %c0_4 = arith.constant 0 : index
    %5 = vector.load %arg4[%c0_2, %c0_3, %c0_4] : memref<1x32x96xbf16, #tpu.memory_space<vmem>>, vector<1x32x96xbf16>
    %6 = vector.shape_cast %5 : vector<1x32x96xbf16> to vector<32x96xbf16>
    %cst = arith.constant dense<0.000000e+00> : vector<8x96xf32>
    %7 = tpu.matmul %4, %6, %cst {dimension_numbers = #tpu.dot_dimension_numbers<[1], [0], [0], [1], [0, 0, 1, 1], [], []>} : vector<8x32xbf16>, vector<32x96xbf16>, vector<8x96xf32> -> vector<8x96xf32>
    %c0_5 = arith.constant 0 : index
    %c0_6 = arith.constant 0 : index
    %c0_7 = arith.constant 0 : index
    %8 = vector.load %arg5[%c0_5, %c0_6, %c0_7] : memref<1x1x96xf32, #tpu.memory_space<vmem>>, vector<1x1x96xf32>
    %9 = vector.shape_cast %8 : vector<1x1x96xf32> to vector<1x96xf32>
    %10 = vector.broadcast %9 : vector<1x96xf32> to vector<8x96xf32>
    %11 = arith.addf %7, %10 : vector<8x96xf32>
    %12 = vector.shape_cast %11 : vector<8x96xf32> to vector<1x8x96xf32>
    %c0_8 = arith.constant 0 : index
    %c0_9 = arith.constant 0 : index
    %c0_10 = arith.constant 0 : index
    %13 = vector.load %arg3[%c0_8, %c0_9, %c0_10] : memref<1x1x8xf32, #tpu.memory_space<vmem>>, vector<1x1x8xf32>
    %cst_11 = arith.constant 0.000000e+00 : f32
    %14 = vector.broadcast %cst_11 : f32 to vector<8x32xf32>
    %15 = vector.extract_strided_slice %12 {offsets = [0, 0, 0], sizes = [1, 8, 4], strides = [1, 1, 1]} : vector<1x8x96xf32> to vector<1x8x4xf32>
    %16 = vector.extract_strided_slice %12 {offsets = [0, 0, 32], sizes = [1, 8, 4], strides = [1, 1, 1]} : vector<1x8x96xf32> to vector<1x8x4xf32>
    %17 = vector.extract_strided_slice %12 {offsets = [0, 0, 64], sizes = [1, 8, 4], strides = [1, 1, 1]} : vector<1x8x96xf32> to vector<1x8x4xf32>
    "tpu.trace_start"() <{level = 10 : i32, message = "bqd,bkd->bqk"}> : () -> ()
    %cst_12 = arith.constant dense<0.000000e+00> : vector<1x8x8xf32>
    %18 = tpu.matmul %15, %16, %cst_12 {dimension_numbers = #tpu.dot_dimension_numbers<[2], [2], [1], [1], [0, 0, 0, 1, 1, 1], [0], [0]>} : vector<1x8x4xf32>, vector<1x8x4xf32>, vector<1x8x8xf32> -> vector<1x8x8xf32>
    "tpu.trace_stop"() : () -> ()
    %19 = vector.broadcast %13 : vector<1x1x8xf32> to vector<1x8x8xf32>
    %20 = arith.addf %18, %19 : vector<1x8x8xf32>
    %cst_13 = arith.constant dense<0xFF800000> : vector<1x8xf32>
    %21 = vector.multi_reduction <maximumf>, %20, %cst_13 [2] : vector<1x8x8xf32> to vector<1x8xf32>
    %22 = vector.shape_cast %21 : vector<1x8xf32> to vector<1x8x1xf32>
    %23 = vector.broadcast %22 : vector<1x8x1xf32> to vector<1x8x8xf32>
    %24 = arith.subf %20, %23 : vector<1x8x8xf32>
    %25 = math.exp %24 : vector<1x8x8xf32>
    %cst_14 = arith.constant dense<0.000000e+00> : vector<1x8xf32>
    %26 = vector.multi_reduction <add>, %25, %cst_14 [2] : vector<1x8x8xf32> to vector<1x8xf32>
    %27 = vector.shape_cast %26 : vector<1x8xf32> to vector<1x8x1xf32>
    %28 = tpu.reciprocal %27 {approx = true} : vector<1x8x1xf32> -> vector<1x8x1xf32>
    %29 = vector.broadcast %28 : vector<1x8x1xf32> to vector<1x8x8xf32>
    %30 = arith.mulf %25, %29 : vector<1x8x8xf32>
    "tpu.trace_start"() <{level = 10 : i32, message = "bqk,bkd->bqd"}> : () -> ()
    %cst_15 = arith.constant dense<0.000000e+00> : vector<1x8x4xf32>
    %31 = tpu.matmul %30, %17, %cst_15 {dimension_numbers = #tpu.dot_dimension_numbers<[2], [1], [1], [2], [0, 0, 0, 1, 1, 2], [0], [0]>} : vector<1x8x8xf32>, vector<1x8x4xf32>, vector<1x8x4xf32> -> vector<1x8x4xf32>
    "tpu.trace_stop"() : () -> ()
    %32 = vector.shape_cast %31 : vector<1x8x4xf32> to vector<8x4xf32>
    %33 = arith.truncf %32 : vector<8x4xf32> to vector<8x4xbf16>
    %c0_16 = arith.constant 0 : index
    %c0_17 = arith.constant 0 : index
    %c0_18 = arith.constant 0 : index
    %34 = vector.load %arg6[%c0_16, %c0_17, %c0_18] : memref<1x32x32xbf16, #tpu.memory_space<vmem>>, vector<1x4x32xbf16>
    %35 = vector.shape_cast %34 : vector<1x4x32xbf16> to vector<4x32xbf16>
    %cst_19 = arith.constant dense<0.000000e+00> : vector<8x32xf32>
    %36 = tpu.matmul %33, %35, %cst_19 {dimension_numbers = #tpu.dot_dimension_numbers<[1], [0], [0], [1], [0, 0, 1, 1], [], []>} : vector<8x4xbf16>, vector<4x32xbf16>, vector<8x32xf32> -> vector<8x32xf32>
    %37 = arith.addf %14, %36 : vector<8x32xf32>
    %38 = vector.extract_strided_slice %12 {offsets = [0, 0, 4], sizes = [1, 8, 4], strides = [1, 1, 1]} : vector<1x8x96xf32> to vector<1x8x4xf32>
    %39 = vector.extract_strided_slice %12 {offsets = [0, 0, 36], sizes = [1, 8, 4], strides = [1, 1, 1]} : vector<1x8x96xf32> to vector<1x8x4xf32>
    %40 = vector.extract_strided_slice %12 {offsets = [0, 0, 68], sizes = [1, 8, 4], strides = [1, 1, 1]} : vector<1x8x96xf32> to vector<1x8x4xf32>
    "tpu.trace_start"() <{level = 10 : i32, message = "bqd,bkd->bqk"}> : () -> ()
    %cst_20 = arith.constant dense<0.000000e+00> : vector<1x8x8xf32>
    %41 = tpu.matmul %38, %39, %cst_20 {dimension_numbers = #tpu.dot_dimension_numbers<[2], [2], [1], [1], [0, 0, 0, 1, 1, 1], [0], [0]>} : vector<1x8x4xf32>, vector<1x8x4xf32>, vector<1x8x8xf32> -> vector<1x8x8xf32>
    "tpu.trace_stop"() : () -> ()
    %42 = vector.broadcast %13 : vector<1x1x8xf32> to vector<1x8x8xf32>
    %43 = arith.addf %41, %42 : vector<1x8x8xf32>
    %cst_21 = arith.constant dense<0xFF800000> : vector<1x8xf32>
    %44 = vector.multi_reduction <maximumf>, %43, %cst_21 [2] : vector<1x8x8xf32> to vector<1x8xf32>
    %45 = vector.shape_cast %44 : vector<1x8xf32> to vector<1x8x1xf32>
    %46 = vector.broadcast %45 : vector<1x8x1xf32> to vector<1x8x8xf32>
    %47 = arith.subf %43, %46 : vector<1x8x8xf32>
    %48 = math.exp %47 : vector<1x8x8xf32>
    %cst_22 = arith.constant dense<0.000000e+00> : vector<1x8xf32>
    %49 = vector.multi_reduction <add>, %48, %cst_22 [2] : vector<1x8x8xf32> to vector<1x8xf32>
    %50 = vector.shape_cast %49 : vector<1x8xf32> to vector<1x8x1xf32>
    %51 = tpu.reciprocal %50 {approx = true} : vector<1x8x1xf32> -> vector<1x8x1xf32>
    %52 = vector.broadcast %51 : vector<1x8x1xf32> to vector<1x8x8xf32>
    %53 = arith.mulf %48, %52 : vector<1x8x8xf32>
    "tpu.trace_start"() <{level = 10 : i32, message = "bqk,bkd->bqd"}> : () -> ()
    %cst_23 = arith.constant dense<0.000000e+00> : vector<1x8x4xf32>
    %54 = tpu.matmul %53, %40, %cst_23 {dimension_numbers = #tpu.dot_dimension_numbers<[2], [1], [1], [2], [0, 0, 0, 1, 1, 2], [0], [0]>} : vector<1x8x8xf32>, vector<1x8x4xf32>, vector<1x8x4xf32> -> vector<1x8x4xf32>
    "tpu.trace_stop"() : () -> ()
    %55 = vector.shape_cast %54 : vector<1x8x4xf32> to vector<8x4xf32>
    %56 = arith.truncf %55 : vector<8x4xf32> to vector<8x4xbf16>
    %c0_24 = arith.constant 0 : index
    %c4 = arith.constant 4 : index
    %c0_25 = arith.constant 0 : index
    %57 = vector.load %arg6[%c0_24, %c4, %c0_25] : memref<1x32x32xbf16, #tpu.memory_space<vmem>>, vector<1x4x32xbf16>
    %58 = vector.shape_cast %57 : vector<1x4x32xbf16> to vector<4x32xbf16>
    %cst_26 = arith.constant dense<0.000000e+00> : vector<8x32xf32>
    %59 = tpu.matmul %56, %58, %cst_26 {dimension_numbers = #tpu.dot_dimension_numbers<[1], [0], [0], [1], [0, 0, 1, 1], [], []>} : vector<8x4xbf16>, vector<4x32xbf16>, vector<8x32xf32> -> vector<8x32xf32>
    %60 = arith.addf %37, %59 : vector<8x32xf32>
    %61 = vector.extract_strided_slice %12 {offsets = [0, 0, 8], sizes = [1, 8, 4], strides = [1, 1, 1]} : vector<1x8x96xf32> to vector<1x8x4xf32>
    %62 = vector.extract_strided_slice %12 {offsets = [0, 0, 40], sizes = [1, 8, 4], strides = [1, 1, 1]} : vector<1x8x96xf32> to vector<1x8x4xf32>
    %63 = vector.extract_strided_slice %12 {offsets = [0, 0, 72], sizes = [1, 8, 4], strides = [1, 1, 1]} : vector<1x8x96xf32> to vector<1x8x4xf32>
    "tpu.trace_start"() <{level = 10 : i32, message = "bqd,bkd->bqk"}> : () -> ()
    %cst_27 = arith.constant dense<0.000000e+00> : vector<1x8x8xf32>
    %64 = tpu.matmul %61, %62, %cst_27 {dimension_numbers = #tpu.dot_dimension_numbers<[2], [2], [1], [1], [0, 0, 0, 1, 1, 1], [0], [0]>} : vector<1x8x4xf32>, vector<1x8x4xf32>, vector<1x8x8xf32> -> vector<1x8x8xf32>
    "tpu.trace_stop"() : () -> ()
    %65 = vector.broadcast %13 : vector<1x1x8xf32> to vector<1x8x8xf32>
    %66 = arith.addf %64, %65 : vector<1x8x8xf32>
    %cst_28 = arith.constant dense<0xFF800000> : vector<1x8xf32>
    %67 = vector.multi_reduction <maximumf>, %66, %cst_28 [2] : vector<1x8x8xf32> to vector<1x8xf32>
    %68 = vector.shape_cast %67 : vector<1x8xf32> to vector<1x8x1xf32>
    %69 = vector.broadcast %68 : vector<1x8x1xf32> to vector<1x8x8xf32>
    %70 = arith.subf %66, %69 : vector<1x8x8xf32>
    %71 = math.exp %70 : vector<1x8x8xf32>
    %cst_29 = arith.constant dense<0.000000e+00> : vector<1x8xf32>
    %72 = vector.multi_reduction <add>, %71, %cst_29 [2] : vector<1x8x8xf32> to vector<1x8xf32>
    %73 = vector.shape_cast %72 : vector<1x8xf32> to vector<1x8x1xf32>
    %74 = tpu.reciprocal %73 {approx = true} : vector<1x8x1xf32> -> vector<1x8x1xf32>
    %75 = vector.broadcast %74 : vector<1x8x1xf32> to vector<1x8x8xf32>
    %76 = arith.mulf %71, %75 : vector<1x8x8xf32>
    "tpu.trace_start"() <{level = 10 : i32, message = "bqk,bkd->bqd"}> : () -> ()
    %cst_30 = arith.constant dense<0.000000e+00> : vector<1x8x4xf32>
    %77 = tpu.matmul %76, %63, %cst_30 {dimension_numbers = #tpu.dot_dimension_numbers<[2], [1], [1], [2], [0, 0, 0, 1, 1, 2], [0], [0]>} : vector<1x8x8xf32>, vector<1x8x4xf32>, vector<1x8x4xf32> -> vector<1x8x4xf32>
    "tpu.trace_stop"() : () -> ()
    %78 = vector.shape_cast %77 : vector<1x8x4xf32> to vector<8x4xf32>
    %79 = arith.truncf %78 : vector<8x4xf32> to vector<8x4xbf16>
    %c0_31 = arith.constant 0 : index
    %c8 = arith.constant 8 : index
    %c0_32 = arith.constant 0 : index
    %80 = vector.load %arg6[%c0_31, %c8, %c0_32] : memref<1x32x32xbf16, #tpu.memory_space<vmem>>, vector<1x4x32xbf16>
    %81 = vector.shape_cast %80 : vector<1x4x32xbf16> to vector<4x32xbf16>
    %cst_33 = arith.constant dense<0.000000e+00> : vector<8x32xf32>
    %82 = tpu.matmul %79, %81, %cst_33 {dimension_numbers = #tpu.dot_dimension_numbers<[1], [0], [0], [1], [0, 0, 1, 1], [], []>} : vector<8x4xbf16>, vector<4x32xbf16>, vector<8x32xf32> -> vector<8x32xf32>
    %83 = arith.addf %60, %82 : vector<8x32xf32>
    %84 = vector.extract_strided_slice %12 {offsets = [0, 0, 12], sizes = [1, 8, 4], strides = [1, 1, 1]} : vector<1x8x96xf32> to vector<1x8x4xf32>
    %85 = vector.extract_strided_slice %12 {offsets = [0, 0, 44], sizes = [1, 8, 4], strides = [1, 1, 1]} : vector<1x8x96xf32> to vector<1x8x4xf32>
    %86 = vector.extract_strided_slice %12 {offsets = [0, 0, 76], sizes = [1, 8, 4], strides = [1, 1, 1]} : vector<1x8x96xf32> to vector<1x8x4xf32>
    "tpu.trace_start"() <{level = 10 : i32, message = "bqd,bkd->bqk"}> : () -> ()
    %cst_34 = arith.constant dense<0.000000e+00> : vector<1x8x8xf32>
    %87 = tpu.matmul %84, %85, %cst_34 {dimension_numbers = #tpu.dot_dimension_numbers<[2], [2], [1], [1], [0, 0, 0, 1, 1, 1], [0], [0]>} : vector<1x8x4xf32>, vector<1x8x4xf32>, vector<1x8x8xf32> -> vector<1x8x8xf32>
    "tpu.trace_stop"() : () -> ()
    %88 = vector.broadcast %13 : vector<1x1x8xf32> to vector<1x8x8xf32>
    %89 = arith.addf %87, %88 : vector<1x8x8xf32>
    %cst_35 = arith.constant dense<0xFF800000> : vector<1x8xf32>
    %90 = vector.multi_reduction <maximumf>, %89, %cst_35 [2] : vector<1x8x8xf32> to vector<1x8xf32>
    %91 = vector.shape_cast %90 : vector<1x8xf32> to vector<1x8x1xf32>
    %92 = vector.broadcast %91 : vector<1x8x1xf32> to vector<1x8x8xf32>
    %93 = arith.subf %89, %92 : vector<1x8x8xf32>
    %94 = math.exp %93 : vector<1x8x8xf32>
    %cst_36 = arith.constant dense<0.000000e+00> : vector<1x8xf32>
    %95 = vector.multi_reduction <add>, %94, %cst_36 [2] : vector<1x8x8xf32> to vector<1x8xf32>
    %96 = vector.shape_cast %95 : vector<1x8xf32> to vector<1x8x1xf32>
    %97 = tpu.reciprocal %96 {approx = true} : vector<1x8x1xf32> -> vector<1x8x1xf32>
    %98 = vector.broadcast %97 : vector<1x8x1xf32> to vector<1x8x8xf32>
    %99 = arith.mulf %94, %98 : vector<1x8x8xf32>
    "tpu.trace_start"() <{level = 10 : i32, message = "bqk,bkd->bqd"}> : () -> ()
    %cst_37 = arith.constant dense<0.000000e+00> : vector<1x8x4xf32>
    %100 = tpu.matmul %99, %86, %cst_37 {dimension_numbers = #tpu.dot_dimension_numbers<[2], [1], [1], [2], [0, 0, 0, 1, 1, 2], [0], [0]>} : vector<1x8x8xf32>, vector<1x8x4xf32>, vector<1x8x4xf32> -> vector<1x8x4xf32>
    "tpu.trace_stop"() : () -> ()
    %101 = vector.shape_cast %100 : vector<1x8x4xf32> to vector<8x4xf32>
    %102 = arith.truncf %101 : vector<8x4xf32> to vector<8x4xbf16>
    %c0_38 = arith.constant 0 : index
    %c12 = arith.constant 12 : index
    %c0_39 = arith.constant 0 : index
    %103 = vector.load %arg6[%c0_38, %c12, %c0_39] : memref<1x32x32xbf16, #tpu.memory_space<vmem>>, vector<1x4x32xbf16>
    %104 = vector.shape_cast %103 : vector<1x4x32xbf16> to vector<4x32xbf16>
    %cst_40 = arith.constant dense<0.000000e+00> : vector<8x32xf32>
    %105 = tpu.matmul %102, %104, %cst_40 {dimension_numbers = #tpu.dot_dimension_numbers<[1], [0], [0], [1], [0, 0, 1, 1], [], []>} : vector<8x4xbf16>, vector<4x32xbf16>, vector<8x32xf32> -> vector<8x32xf32>
    %106 = arith.addf %83, %105 : vector<8x32xf32>
    %107 = vector.extract_strided_slice %12 {offsets = [0, 0, 16], sizes = [1, 8, 4], strides = [1, 1, 1]} : vector<1x8x96xf32> to vector<1x8x4xf32>
    %108 = vector.extract_strided_slice %12 {offsets = [0, 0, 48], sizes = [1, 8, 4], strides = [1, 1, 1]} : vector<1x8x96xf32> to vector<1x8x4xf32>
    %109 = vector.extract_strided_slice %12 {offsets = [0, 0, 80], sizes = [1, 8, 4], strides = [1, 1, 1]} : vector<1x8x96xf32> to vector<1x8x4xf32>
    "tpu.trace_start"() <{level = 10 : i32, message = "bqd,bkd->bqk"}> : () -> ()
    %cst_41 = arith.constant dense<0.000000e+00> : vector<1x8x8xf32>
    %110 = tpu.matmul %107, %108, %cst_41 {dimension_numbers = #tpu.dot_dimension_numbers<[2], [2], [1], [1], [0, 0, 0, 1, 1, 1], [0], [0]>} : vector<1x8x4xf32>, vector<1x8x4xf32>, vector<1x8x8xf32> -> vector<1x8x8xf32>
    "tpu.trace_stop"() : () -> ()
    %111 = vector.broadcast %13 : vector<1x1x8xf32> to vector<1x8x8xf32>
    %112 = arith.addf %110, %111 : vector<1x8x8xf32>
    %cst_42 = arith.constant dense<0xFF800000> : vector<1x8xf32>
    %113 = vector.multi_reduction <maximumf>, %112, %cst_42 [2] : vector<1x8x8xf32> to vector<1x8xf32>
    %114 = vector.shape_cast %113 : vector<1x8xf32> to vector<1x8x1xf32>
    %115 = vector.broadcast %114 : vector<1x8x1xf32> to vector<1x8x8xf32>
    %116 = arith.subf %112, %115 : vector<1x8x8xf32>
    %117 = math.exp %116 : vector<1x8x8xf32>
    %cst_43 = arith.constant dense<0.000000e+00> : vector<1x8xf32>
    %118 = vector.multi_reduction <add>, %117, %cst_43 [2] : vector<1x8x8xf32> to vector<1x8xf32>
    %119 = vector.shape_cast %118 : vector<1x8xf32> to vector<1x8x1xf32>
    %120 = tpu.reciprocal %119 {approx = true} : vector<1x8x1xf32> -> vector<1x8x1xf32>
    %121 = vector.broadcast %120 : vector<1x8x1xf32> to vector<1x8x8xf32>
    %122 = arith.mulf %117, %121 : vector<1x8x8xf32>
    "tpu.trace_start"() <{level = 10 : i32, message = "bqk,bkd->bqd"}> : () -> ()
    %cst_44 = arith.constant dense<0.000000e+00> : vector<1x8x4xf32>
    %123 = tpu.matmul %122, %109, %cst_44 {dimension_numbers = #tpu.dot_dimension_numbers<[2], [1], [1], [2], [0, 0, 0, 1, 1, 2], [0], [0]>} : vector<1x8x8xf32>, vector<1x8x4xf32>, vector<1x8x4xf32> -> vector<1x8x4xf32>
    "tpu.trace_stop"() : () -> ()
    %124 = vector.shape_cast %123 : vector<1x8x4xf32> to vector<8x4xf32>
    %125 = arith.truncf %124 : vector<8x4xf32> to vector<8x4xbf16>
    %c0_45 = arith.constant 0 : index
    %c16 = arith.constant 16 : index
    %c0_46 = arith.constant 0 : index
    %126 = vector.load %arg6[%c0_45, %c16, %c0_46] : memref<1x32x32xbf16, #tpu.memory_space<vmem>>, vector<1x4x32xbf16>
    %127 = vector.shape_cast %126 : vector<1x4x32xbf16> to vector<4x32xbf16>
    %cst_47 = arith.constant dense<0.000000e+00> : vector<8x32xf32>
    %128 = tpu.matmul %125, %127, %cst_47 {dimension_numbers = #tpu.dot_dimension_numbers<[1], [0], [0], [1], [0, 0, 1, 1], [], []>} : vector<8x4xbf16>, vector<4x32xbf16>, vector<8x32xf32> -> vector<8x32xf32>
    %129 = arith.addf %106, %128 : vector<8x32xf32>
    %130 = vector.extract_strided_slice %12 {offsets = [0, 0, 20], sizes = [1, 8, 4], strides = [1, 1, 1]} : vector<1x8x96xf32> to vector<1x8x4xf32>
    %131 = vector.extract_strided_slice %12 {offsets = [0, 0, 52], sizes = [1, 8, 4], strides = [1, 1, 1]} : vector<1x8x96xf32> to vector<1x8x4xf32>
    %132 = vector.extract_strided_slice %12 {offsets = [0, 0, 84], sizes = [1, 8, 4], strides = [1, 1, 1]} : vector<1x8x96xf32> to vector<1x8x4xf32>
    "tpu.trace_start"() <{level = 10 : i32, message = "bqd,bkd->bqk"}> : () -> ()
    %cst_48 = arith.constant dense<0.000000e+00> : vector<1x8x8xf32>
    %133 = tpu.matmul %130, %131, %cst_48 {dimension_numbers = #tpu.dot_dimension_numbers<[2], [2], [1], [1], [0, 0, 0, 1, 1, 1], [0], [0]>} : vector<1x8x4xf32>, vector<1x8x4xf32>, vector<1x8x8xf32> -> vector<1x8x8xf32>
    "tpu.trace_stop"() : () -> ()
    %134 = vector.broadcast %13 : vector<1x1x8xf32> to vector<1x8x8xf32>
    %135 = arith.addf %133, %134 : vector<1x8x8xf32>
    %cst_49 = arith.constant dense<0xFF800000> : vector<1x8xf32>
    %136 = vector.multi_reduction <maximumf>, %135, %cst_49 [2] : vector<1x8x8xf32> to vector<1x8xf32>
    %137 = vector.shape_cast %136 : vector<1x8xf32> to vector<1x8x1xf32>
    %138 = vector.broadcast %137 : vector<1x8x1xf32> to vector<1x8x8xf32>
    %139 = arith.subf %135, %138 : vector<1x8x8xf32>
    %140 = math.exp %139 : vector<1x8x8xf32>
    %cst_50 = arith.constant dense<0.000000e+00> : vector<1x8xf32>
    %141 = vector.multi_reduction <add>, %140, %cst_50 [2] : vector<1x8x8xf32> to vector<1x8xf32>
    %142 = vector.shape_cast %141 : vector<1x8xf32> to vector<1x8x1xf32>
    %143 = tpu.reciprocal %142 {approx = true} : vector<1x8x1xf32> -> vector<1x8x1xf32>
    %144 = vector.broadcast %143 : vector<1x8x1xf32> to vector<1x8x8xf32>
    %145 = arith.mulf %140, %144 : vector<1x8x8xf32>
    "tpu.trace_start"() <{level = 10 : i32, message = "bqk,bkd->bqd"}> : () -> ()
    %cst_51 = arith.constant dense<0.000000e+00> : vector<1x8x4xf32>
    %146 = tpu.matmul %145, %132, %cst_51 {dimension_numbers = #tpu.dot_dimension_numbers<[2], [1], [1], [2], [0, 0, 0, 1, 1, 2], [0], [0]>} : vector<1x8x8xf32>, vector<1x8x4xf32>, vector<1x8x4xf32> -> vector<1x8x4xf32>
    "tpu.trace_stop"() : () -> ()
    %147 = vector.shape_cast %146 : vector<1x8x4xf32> to vector<8x4xf32>
    %148 = arith.truncf %147 : vector<8x4xf32> to vector<8x4xbf16>
    %c0_52 = arith.constant 0 : index
    %c20 = arith.constant 20 : index
    %c0_53 = arith.constant 0 : index
    %149 = vector.load %arg6[%c0_52, %c20, %c0_53] : memref<1x32x32xbf16, #tpu.memory_space<vmem>>, vector<1x4x32xbf16>
    %150 = vector.shape_cast %149 : vector<1x4x32xbf16> to vector<4x32xbf16>
    %cst_54 = arith.constant dense<0.000000e+00> : vector<8x32xf32>
    %151 = tpu.matmul %148, %150, %cst_54 {dimension_numbers = #tpu.dot_dimension_numbers<[1], [0], [0], [1], [0, 0, 1, 1], [], []>} : vector<8x4xbf16>, vector<4x32xbf16>, vector<8x32xf32> -> vector<8x32xf32>
    %152 = arith.addf %129, %151 : vector<8x32xf32>
    %153 = vector.extract_strided_slice %12 {offsets = [0, 0, 24], sizes = [1, 8, 4], strides = [1, 1, 1]} : vector<1x8x96xf32> to vector<1x8x4xf32>
    %154 = vector.extract_strided_slice %12 {offsets = [0, 0, 56], sizes = [1, 8, 4], strides = [1, 1, 1]} : vector<1x8x96xf32> to vector<1x8x4xf32>
    %155 = vector.extract_strided_slice %12 {offsets = [0, 0, 88], sizes = [1, 8, 4], strides = [1, 1, 1]} : vector<1x8x96xf32> to vector<1x8x4xf32>
    "tpu.trace_start"() <{level = 10 : i32, message = "bqd,bkd->bqk"}> : () -> ()
    %cst_55 = arith.constant dense<0.000000e+00> : vector<1x8x8xf32>
    %156 = tpu.matmul %153, %154, %cst_55 {dimension_numbers = #tpu.dot_dimension_numbers<[2], [2], [1], [1], [0, 0, 0, 1, 1, 1], [0], [0]>} : vector<1x8x4xf32>, vector<1x8x4xf32>, vector<1x8x8xf32> -> vector<1x8x8xf32>
    "tpu.trace_stop"() : () -> ()
    %157 = vector.broadcast %13 : vector<1x1x8xf32> to vector<1x8x8xf32>
    %158 = arith.addf %156, %157 : vector<1x8x8xf32>
    %cst_56 = arith.constant dense<0xFF800000> : vector<1x8xf32>
    %159 = vector.multi_reduction <maximumf>, %158, %cst_56 [2] : vector<1x8x8xf32> to vector<1x8xf32>
    %160 = vector.shape_cast %159 : vector<1x8xf32> to vector<1x8x1xf32>
    %161 = vector.broadcast %160 : vector<1x8x1xf32> to vector<1x8x8xf32>
    %162 = arith.subf %158, %161 : vector<1x8x8xf32>
    %163 = math.exp %162 : vector<1x8x8xf32>
    %cst_57 = arith.constant dense<0.000000e+00> : vector<1x8xf32>
    %164 = vector.multi_reduction <add>, %163, %cst_57 [2] : vector<1x8x8xf32> to vector<1x8xf32>
    %165 = vector.shape_cast %164 : vector<1x8xf32> to vector<1x8x1xf32>
    %166 = tpu.reciprocal %165 {approx = true} : vector<1x8x1xf32> -> vector<1x8x1xf32>
    %167 = vector.broadcast %166 : vector<1x8x1xf32> to vector<1x8x8xf32>
    %168 = arith.mulf %163, %167 : vector<1x8x8xf32>
    "tpu.trace_start"() <{level = 10 : i32, message = "bqk,bkd->bqd"}> : () -> ()
    %cst_58 = arith.constant dense<0.000000e+00> : vector<1x8x4xf32>
    %169 = tpu.matmul %168, %155, %cst_58 {dimension_numbers = #tpu.dot_dimension_numbers<[2], [1], [1], [2], [0, 0, 0, 1, 1, 2], [0], [0]>} : vector<1x8x8xf32>, vector<1x8x4xf32>, vector<1x8x4xf32> -> vector<1x8x4xf32>
    "tpu.trace_stop"() : () -> ()
    %170 = vector.shape_cast %169 : vector<1x8x4xf32> to vector<8x4xf32>
    %171 = arith.truncf %170 : vector<8x4xf32> to vector<8x4xbf16>
    %c0_59 = arith.constant 0 : index
    %c24 = arith.constant 24 : index
    %c0_60 = arith.constant 0 : index
    %172 = vector.load %arg6[%c0_59, %c24, %c0_60] : memref<1x32x32xbf16, #tpu.memory_space<vmem>>, vector<1x4x32xbf16>
    %173 = vector.shape_cast %172 : vector<1x4x32xbf16> to vector<4x32xbf16>
    %cst_61 = arith.constant dense<0.000000e+00> : vector<8x32xf32>
    %174 = tpu.matmul %171, %173, %cst_61 {dimension_numbers = #tpu.dot_dimension_numbers<[1], [0], [0], [1], [0, 0, 1, 1], [], []>} : vector<8x4xbf16>, vector<4x32xbf16>, vector<8x32xf32> -> vector<8x32xf32>
    %175 = arith.addf %152, %174 : vector<8x32xf32>
    %176 = vector.extract_strided_slice %12 {offsets = [0, 0, 28], sizes = [1, 8, 4], strides = [1, 1, 1]} : vector<1x8x96xf32> to vector<1x8x4xf32>
    %177 = vector.extract_strided_slice %12 {offsets = [0, 0, 60], sizes = [1, 8, 4], strides = [1, 1, 1]} : vector<1x8x96xf32> to vector<1x8x4xf32>
    %178 = vector.extract_strided_slice %12 {offsets = [0, 0, 92], sizes = [1, 8, 4], strides = [1, 1, 1]} : vector<1x8x96xf32> to vector<1x8x4xf32>
    "tpu.trace_start"() <{level = 10 : i32, message = "bqd,bkd->bqk"}> : () -> ()
    %cst_62 = arith.constant dense<0.000000e+00> : vector<1x8x8xf32>
    %179 = tpu.matmul %176, %177, %cst_62 {dimension_numbers = #tpu.dot_dimension_numbers<[2], [2], [1], [1], [0, 0, 0, 1, 1, 1], [0], [0]>} : vector<1x8x4xf32>, vector<1x8x4xf32>, vector<1x8x8xf32> -> vector<1x8x8xf32>
    "tpu.trace_stop"() : () -> ()
    %180 = vector.broadcast %13 : vector<1x1x8xf32> to vector<1x8x8xf32>
    %181 = arith.addf %179, %180 : vector<1x8x8xf32>
    %cst_63 = arith.constant dense<0xFF800000> : vector<1x8xf32>
    %182 = vector.multi_reduction <maximumf>, %181, %cst_63 [2] : vector<1x8x8xf32> to vector<1x8xf32>
    %183 = vector.shape_cast %182 : vector<1x8xf32> to vector<1x8x1xf32>
    %184 = vector.broadcast %183 : vector<1x8x1xf32> to vector<1x8x8xf32>
    %185 = arith.subf %181, %184 : vector<1x8x8xf32>
    %186 = math.exp %185 : vector<1x8x8xf32>
    %cst_64 = arith.constant dense<0.000000e+00> : vector<1x8xf32>
    %187 = vector.multi_reduction <add>, %186, %cst_64 [2] : vector<1x8x8xf32> to vector<1x8xf32>
    %188 = vector.shape_cast %187 : vector<1x8xf32> to vector<1x8x1xf32>
    %189 = tpu.reciprocal %188 {approx = true} : vector<1x8x1xf32> -> vector<1x8x1xf32>
    %190 = vector.broadcast %189 : vector<1x8x1xf32> to vector<1x8x8xf32>
    %191 = arith.mulf %186, %190 : vector<1x8x8xf32>
    "tpu.trace_start"() <{level = 10 : i32, message = "bqk,bkd->bqd"}> : () -> ()
    %cst_65 = arith.constant dense<0.000000e+00> : vector<1x8x4xf32>
    %192 = tpu.matmul %191, %178, %cst_65 {dimension_numbers = #tpu.dot_dimension_numbers<[2], [1], [1], [2], [0, 0, 0, 1, 1, 2], [0], [0]>} : vector<1x8x8xf32>, vector<1x8x4xf32>, vector<1x8x4xf32> -> vector<1x8x4xf32>
    "tpu.trace_stop"() : () -> ()
    %193 = vector.shape_cast %192 : vector<1x8x4xf32> to vector<8x4xf32>
    %194 = arith.truncf %193 : vector<8x4xf32> to vector<8x4xbf16>
    %c0_66 = arith.constant 0 : index
    %c28 = arith.constant 28 : index
    %c0_67 = arith.constant 0 : index
    %195 = vector.load %arg6[%c0_66, %c28, %c0_67] : memref<1x32x32xbf16, #tpu.memory_space<vmem>>, vector<1x4x32xbf16>
    %196 = vector.shape_cast %195 : vector<1x4x32xbf16> to vector<4x32xbf16>
    %cst_68 = arith.constant dense<0.000000e+00> : vector<8x32xf32>
    %197 = tpu.matmul %194, %196, %cst_68 {dimension_numbers = #tpu.dot_dimension_numbers<[1], [0], [0], [1], [0, 0, 1, 1], [], []>} : vector<8x4xbf16>, vector<4x32xbf16>, vector<8x32xf32> -> vector<8x32xf32>
    %198 = arith.addf %175, %197 : vector<8x32xf32>
    %c0_69 = arith.constant 0 : index
    %c0_70 = arith.constant 0 : index
    %c0_71 = arith.constant 0 : index
    %199 = vector.load %arg7[%c0_69, %c0_70, %c0_71] : memref<1x1x32xf32, #tpu.memory_space<vmem>>, vector<1x1x32xf32>
    %200 = vector.shape_cast %199 : vector<1x1x32xf32> to vector<1x32xf32>
    %201 = vector.broadcast %200 : vector<1x32xf32> to vector<8x32xf32>
    %202 = arith.addf %198, %201 : vector<8x32xf32>
    %203 = arith.addf %3, %202 : vector<8x32xf32>
    %cst_72 = arith.constant dense<0.000000e+00> : vector<8xf32>
    %204 = vector.multi_reduction <add>, %203, %cst_72 [1] : vector<8x32xf32> to vector<8xf32>
    %205 = vector.shape_cast %204 : vector<8xf32> to vector<8x1xf32>
    %cst_73 = arith.constant 3.200000e+01 : f32
    %206 = vector.broadcast %cst_73 : f32 to vector<8x1xf32>
    %207 = arith.divf %205, %206 : vector<8x1xf32>
    %208 = vector.broadcast %207 : vector<8x1xf32> to vector<8x32xf32>
    %209 = arith.subf %203, %208 : vector<8x32xf32>
    %210 = arith.mulf %209, %209 : vector<8x32xf32>
    %cst_74 = arith.constant dense<0.000000e+00> : vector<8xf32>
    %211 = vector.multi_reduction <add>, %210, %cst_74 [1] : vector<8x32xf32> to vector<8xf32>
    %212 = vector.shape_cast %211 : vector<8xf32> to vector<8x1xf32>
    %cst_75 = arith.constant 3.200000e+01 : f32
    %213 = vector.broadcast %cst_75 : f32 to vector<8x1xf32>
    %214 = arith.divf %212, %213 : vector<8x1xf32>
    %215 = vector.broadcast %207 : vector<8x1xf32> to vector<8x32xf32>
    %216 = arith.subf %203, %215 : vector<8x32xf32>
    %cst_76 = arith.constant 9.99999974E-6 : f32
    %217 = vector.broadcast %cst_76 : f32 to vector<8x1xf32>
    %218 = arith.addf %214, %217 : vector<8x1xf32>
    %219 = math.rsqrt %218 : vector<8x1xf32>
    %220 = vector.broadcast %219 : vector<8x1xf32> to vector<8x32xf32>
    %221 = arith.mulf %216, %220 : vector<8x32xf32>
    %c0_77 = arith.constant 0 : index
    %c0_78 = arith.constant 0 : index
    %c0_79 = arith.constant 0 : index
    %222 = vector.load %arg12[%c0_77, %c0_78, %c0_79] : memref<1x1x32xf32, #tpu.memory_space<vmem>>, vector<1x1x32xf32>
    %223 = vector.shape_cast %222 : vector<1x1x32xf32> to vector<1x32xf32>
    %224 = vector.broadcast %223 : vector<1x32xf32> to vector<8x32xf32>
    %225 = arith.mulf %221, %224 : vector<8x32xf32>
    %c0_80 = arith.constant 0 : index
    %c0_81 = arith.constant 0 : index
    %c0_82 = arith.constant 0 : index
    %226 = vector.load %arg13[%c0_80, %c0_81, %c0_82] : memref<1x1x32xf32, #tpu.memory_space<vmem>>, vector<1x1x32xf32>
    %227 = vector.shape_cast %226 : vector<1x1x32xf32> to vector<1x32xf32>
    %228 = vector.broadcast %227 : vector<1x32xf32> to vector<8x32xf32>
    %229 = arith.addf %225, %228 : vector<8x32xf32>
    %230 = arith.truncf %229 : vector<8x32xf32> to vector<8x32xbf16>
    %c0_83 = arith.constant 0 : index
    %c0_84 = arith.constant 0 : index
    %c0_85 = arith.constant 0 : index
    %231 = vector.load %arg8[%c0_83, %c0_84, %c0_85] : memref<1x32x128xbf16, #tpu.memory_space<vmem>>, vector<1x32x128xbf16>
    %232 = vector.shape_cast %231 : vector<1x32x128xbf16> to vector<32x128xbf16>
    %cst_86 = arith.constant dense<0.000000e+00> : vector<8x128xf32>
    %233 = tpu.matmul %230, %232, %cst_86 {dimension_numbers = #tpu.dot_dimension_numbers<[1], [0], [0], [1], [0, 0, 1, 1], [], []>} : vector<8x32xbf16>, vector<32x128xbf16>, vector<8x128xf32> -> vector<8x128xf32>
    %c0_87 = arith.constant 0 : index
    %c0_88 = arith.constant 0 : index
    %c0_89 = arith.constant 0 : index
    %234 = vector.load %arg9[%c0_87, %c0_88, %c0_89] : memref<1x1x128xf32, #tpu.memory_space<vmem>>, vector<1x1x128xf32>
    %235 = vector.shape_cast %234 : vector<1x1x128xf32> to vector<1x128xf32>
    %236 = vector.broadcast %235 : vector<1x128xf32> to vector<8x128xf32>
    %237 = arith.addf %233, %236 : vector<8x128xf32>
    %cst_90 = arith.constant 0.000000e+00 : f32
    %238 = vector.broadcast %cst_90 : f32 to vector<8x128xf32>
    %239 = arith.maximumf %237, %238 : vector<8x128xf32>
    %240 = arith.truncf %239 : vector<8x128xf32> to vector<8x128xbf16>
    %c0_91 = arith.constant 0 : index
    %c0_92 = arith.constant 0 : index
    %c0_93 = arith.constant 0 : index
    %241 = vector.load %arg10[%c0_91, %c0_92, %c0_93] : memref<1x128x32xbf16, #tpu.memory_space<vmem>>, vector<1x128x32xbf16>
    %242 = vector.shape_cast %241 : vector<1x128x32xbf16> to vector<128x32xbf16>
    %cst_94 = arith.constant dense<0.000000e+00> : vector<8x32xf32>
    %243 = tpu.matmul %240, %242, %cst_94 {dimension_numbers = #tpu.dot_dimension_numbers<[1], [0], [0], [1], [0, 0, 1, 1], [], []>} : vector<8x128xbf16>, vector<128x32xbf16>, vector<8x32xf32> -> vector<8x32xf32>
    %c0_95 = arith.constant 0 : index
    %c0_96 = arith.constant 0 : index
    %c0_97 = arith.constant 0 : index
    %244 = vector.load %arg11[%c0_95, %c0_96, %c0_97] : memref<1x1x32xf32, #tpu.memory_space<vmem>>, vector<1x1x32xf32>
    %245 = vector.shape_cast %244 : vector<1x1x32xf32> to vector<1x32xf32>
    %246 = vector.broadcast %245 : vector<1x32xf32> to vector<8x32xf32>
    %247 = arith.addf %243, %246 : vector<8x32xf32>
    %248 = arith.addf %229, %247 : vector<8x32xf32>
    %cst_98 = arith.constant dense<0.000000e+00> : vector<8xf32>
    %249 = vector.multi_reduction <add>, %248, %cst_98 [1] : vector<8x32xf32> to vector<8xf32>
    %250 = vector.shape_cast %249 : vector<8xf32> to vector<8x1xf32>
    %cst_99 = arith.constant 3.200000e+01 : f32
    %251 = vector.broadcast %cst_99 : f32 to vector<8x1xf32>
    %252 = arith.divf %250, %251 : vector<8x1xf32>
    %253 = vector.broadcast %252 : vector<8x1xf32> to vector<8x32xf32>
    %254 = arith.subf %248, %253 : vector<8x32xf32>
    %255 = arith.mulf %254, %254 : vector<8x32xf32>
    %cst_100 = arith.constant dense<0.000000e+00> : vector<8xf32>
    %256 = vector.multi_reduction <add>, %255, %cst_100 [1] : vector<8x32xf32> to vector<8xf32>
    %257 = vector.shape_cast %256 : vector<8xf32> to vector<8x1xf32>
    %cst_101 = arith.constant 3.200000e+01 : f32
    %258 = vector.broadcast %cst_101 : f32 to vector<8x1xf32>
    %259 = arith.divf %257, %258 : vector<8x1xf32>
    %260 = vector.broadcast %252 : vector<8x1xf32> to vector<8x32xf32>
    %261 = arith.subf %248, %260 : vector<8x32xf32>
    %cst_102 = arith.constant 9.99999974E-6 : f32
    %262 = vector.broadcast %cst_102 : f32 to vector<8x1xf32>
    %263 = arith.addf %259, %262 : vector<8x1xf32>
    %264 = math.rsqrt %263 : vector<8x1xf32>
    %265 = vector.broadcast %264 : vector<8x1xf32> to vector<8x32xf32>
    %266 = arith.mulf %261, %265 : vector<8x32xf32>
    %c0_103 = arith.constant 0 : index
    %c0_104 = arith.constant 0 : index
    %c0_105 = arith.constant 0 : index
    %267 = vector.load %arg14[%c0_103, %c0_104, %c0_105] : memref<1x1x32xf32, #tpu.memory_space<vmem>>, vector<1x1x32xf32>
    %268 = vector.shape_cast %267 : vector<1x1x32xf32> to vector<1x32xf32>
    %269 = vector.broadcast %268 : vector<1x32xf32> to vector<8x32xf32>
    %270 = arith.mulf %266, %269 : vector<8x32xf32>
    %c0_106 = arith.constant 0 : index
    %c0_107 = arith.constant 0 : index
    %c0_108 = arith.constant 0 : index
    %271 = vector.load %arg15[%c0_106, %c0_107, %c0_108] : memref<1x1x32xf32, #tpu.memory_space<vmem>>, vector<1x1x32xf32>
    %272 = vector.shape_cast %271 : vector<1x1x32xf32> to vector<1x32xf32>
    %273 = vector.broadcast %272 : vector<1x32xf32> to vector<8x32xf32>
    %274 = arith.addf %270, %273 : vector<8x32xf32>
    %c0_109 = arith.constant 0 : index
    %c0_110 = arith.constant 0 : index
    %275 = vector.load %arg19[%c0_109, %c0_110] : memref<8x32xf32, #tpu.memory_space<vmem>>, vector<8x32xf32>
    tpu.vector_store %arg19[%c0_109, %c0_110], %274 {strides = array<i32>} : memref<8x32xf32, #tpu.memory_space<vmem>>, vector<8x32xf32>,
    %c5_i32 = arith.constant 5 : i32
    %276 = arith.cmpi eq, %arg1, %c5_i32 : i32
    %277 = arith.extui %276 : i1 to i32
    %c0_i32_111 = arith.constant 0 : i32
    %278 = arith.cmpi ne, %277, %c0_i32_111 : i32
    scf.if %278 {
      %279 = arith.truncf %274 : vector<8x32xf32> to vector<8x32xbf16>
      %c0_112 = arith.constant 0 : index
      %c0_113 = arith.constant 0 : index
      %280 = vector.load %arg16[%c0_112, %c0_113] : memref<32x128xbf16, #tpu.memory_space<vmem>>, vector<32x128xbf16>
      %cst_114 = arith.constant dense<0.000000e+00> : vector<8x128xf32>
      %281 = tpu.matmul %279, %280, %cst_114 {dimension_numbers = #tpu.dot_dimension_numbers<[1], [0], [0], [1], [0, 0, 1, 1], [], []>} : vector<8x32xbf16>, vector<32x128xbf16>, vector<8x128xf32> -> vector<8x128xf32>
      %c0_115 = arith.constant 0 : index
      %c0_116 = arith.constant 0 : index
      %282 = vector.load %arg17[%c0_115, %c0_116] : memref<1x128xf32, #tpu.memory_space<vmem>>, vector<1x128xf32>
      %283 = vector.broadcast %282 : vector<1x128xf32> to vector<8x128xf32>
      %284 = arith.addf %281, %283 : vector<8x128xf32>
      %285 = vector.shape_cast %284 : vector<8x128xf32> to vector<1x8x128xf32>
      %c0_117 = arith.constant 0 : index
      %c0_118 = arith.constant 0 : index
      %c0_119 = arith.constant 0 : index
      %286 = vector.load %arg18[%c0_117, %c0_118, %c0_119] : memref<1x8x128xf32, #tpu.memory_space<vmem>>, vector<1x8x128xf32>
      tpu.vector_store %arg18[%c0_117, %c0_118, %c0_119], %285 {strides = array<i32>} : memref<1x8x128xf32, #tpu.memory_space<vmem>>, vector<1x8x128xf32>,
    } else {
    }
    return
  }
  func.func @transform_0(%arg0: i32, %arg1: i32) -> (i32, i32, i32) {
    %c0_i32 = arith.constant 0 : i32
    %c0_i32_0 = arith.constant 0 : i32
    %c0_i32_1 = arith.constant 0 : i32
    return %arg0, %c0_i32, %c0_i32_0 : i32, i32, i32
  }
  func.func @transform_1(%arg0: i32, %arg1: i32) -> (i32, i32, i32) {
    %c0_i32 = arith.constant 0 : i32
    %c0_i32_0 = arith.constant 0 : i32
    %c0_i32_1 = arith.constant 0 : i32
    return %arg0, %c0_i32, %c0_i32_0 : i32, i32, i32
  }
  func.func @transform_2(%arg0: i32, %arg1: i32) -> (i32, i32, i32) {
    %c0_i32 = arith.constant 0 : i32
    %c0_i32_0 = arith.constant 0 : i32
    %c0_i32_1 = arith.constant 0 : i32
    return %arg1, %c0_i32, %c0_i32_0 : i32, i32, i32
  }
  func.func @transform_3(%arg0: i32, %arg1: i32) -> (i32, i32, i32) {
    %c0_i32 = arith.constant 0 : i32
    %c0_i32_0 = arith.constant 0 : i32
    %c0_i32_1 = arith.constant 0 : i32
    return %arg1, %c0_i32, %c0_i32_0 : i32, i32, i32
  }
  func.func @transform_4(%arg0: i32, %arg1: i32) -> (i32, i32, i32) {
    %c0_i32 = arith.constant 0 : i32
    %c0_i32_0 = arith.constant 0 : i32
    %c0_i32_1 = arith.constant 0 : i32
    return %arg1, %c0_i32, %c0_i32_0 : i32, i32, i32
  }
  func.func @transform_5(%arg0: i32, %arg1: i32) -> (i32, i32, i32) {
    %c0_i32 = arith.constant 0 : i32
    %c0_i32_0 = arith.constant 0 : i32
    %c0_i32_1 = arith.constant 0 : i32
    return %arg1, %c0_i32, %c0_i32_0 : i32, i32, i32
  }
  func.func @transform_6(%arg0: i32, %arg1: i32) -> (i32, i32, i32) {
    %c0_i32 = arith.constant 0 : i32
    %c0_i32_0 = arith.constant 0 : i32
    %c0_i32_1 = arith.constant 0 : i32
    return %arg1, %c0_i32, %c0_i32_0 : i32, i32, i32
  }
  func.func @transform_7(%arg0: i32, %arg1: i32) -> (i32, i32, i32) {
    %c0_i32 = arith.constant 0 : i32
    %c0_i32_0 = arith.constant 0 : i32
    %c0_i32_1 = arith.constant 0 : i32
    return %arg1, %c0_i32, %c0_i32_0 : i32, i32, i32
  }
  func.func @transform_8(%arg0: i32, %arg1: i32) -> (i32, i32, i32) {
    %c0_i32 = arith.constant 0 : i32
    %c0_i32_0 = arith.constant 0 : i32
    %c0_i32_1 = arith.constant 0 : i32
    return %arg1, %c0_i32, %c0_i32_0 : i32, i32, i32
  }
  func.func @transform_9(%arg0: i32, %arg1: i32) -> (i32, i32, i32) {
    %c0_i32 = arith.constant 0 : i32
    %c0_i32_0 = arith.constant 0 : i32
    %c0_i32_1 = arith.constant 0 : i32
    return %arg1, %c0_i32, %c0_i32_0 : i32, i32, i32
  }
  func.func @transform_10(%arg0: i32, %arg1: i32) -> (i32, i32, i32) {
    %c0_i32 = arith.constant 0 : i32
    %c0_i32_0 = arith.constant 0 : i32
    %c0_i32_1 = arith.constant 0 : i32
    return %arg1, %c0_i32, %c0_i32_0 : i32, i32, i32
  }
  func.func @transform_11(%arg0: i32, %arg1: i32) -> (i32, i32, i32) {
    %c0_i32 = arith.constant 0 : i32
    %c0_i32_0 = arith.constant 0 : i32
    %c0_i32_1 = arith.constant 0 : i32
    return %arg1, %c0_i32, %c0_i32_0 : i32, i32, i32
  }
  func.func @transform_12(%arg0: i32, %arg1: i32) -> (i32, i32, i32) {
    %c0_i32 = arith.constant 0 : i32
    %c0_i32_0 = arith.constant 0 : i32
    %c0_i32_1 = arith.constant 0 : i32
    return %arg1, %c0_i32, %c0_i32_0 : i32, i32, i32
  }
  func.func @transform_13(%arg0: i32, %arg1: i32) -> (i32, i32, i32) {
    %c0_i32 = arith.constant 0 : i32
    %c0_i32_0 = arith.constant 0 : i32
    %c0_i32_1 = arith.constant 0 : i32
    return %arg1, %c0_i32, %c0_i32_0 : i32, i32, i32
  }
  func.func @transform_14(%arg0: i32, %arg1: i32) -> (i32, i32) {
    %c0_i32 = arith.constant 0 : i32
    %c0_i32_0 = arith.constant 0 : i32
    %c0_i32_1 = arith.constant 0 : i32
    return %c0_i32, %c0_i32_0 : i32, i32
  }
  func.func @transform_15(%arg0: i32, %arg1: i32) -> (i32, i32) {
    %c0_i32 = arith.constant 0 : i32
    %c0_i32_0 = arith.constant 0 : i32
    %c0_i32_1 = arith.constant 0 : i32
    return %c0_i32, %c0_i32_0 : i32, i32
  }
  func.func @transform_16(%arg0: i32, %arg1: i32) -> (i32, i32, i32) {
    %c0_i32 = arith.constant 0 : i32
    %c0_i32_0 = arith.constant 0 : i32
    %c0_i32_1 = arith.constant 0 : i32
    return %arg0, %c0_i32, %c0_i32_0 : i32, i32, i32
  }
}

</mosaic_0001>

<bundles_post_ra>
// kernel: model_forward.1
= control target key start
LH: loop header
LB: loop body
LE: loop exit
PB: predicated region body
PF: predicated region fallthrough
CT: control target
= control target key end

     0   :  { %s2321_s21 = smov 0   ;;  %s2323_s22 = smov 0   ;;  %s2644_s0 = inlined_call_operand.vmem [shape: f32[2,8,32], index: 0, kind: input, shape index: {}]   ;;  %s2645_s1 = inlined_call_operand.vmem [shape: f32[2,1,8], index: 1, kind: input, shape index: {}]   ;;  %s2646_s2 = inlined_call_operand.vmem [shape: bf16[6,32,96], index: 2, kind: input, shape index: {}]   ;;  %s2647_s3 = inlined_call_operand.vmem [shape: f32[6,1,96], index: 3, kind: input, shape index: {}]   ;;  %s2648_s4 = inlined_call_operand.vmem [shape: bf16[6,32,32], index: 4, kind: input, shape index: {}]   ;;  %s2649_s5 = inlined_call_operand.vmem [shape: f32[6,1,32], index: 5, kind: input, shape index: {}]   ;;  %s2650_s6 = inlined_call_operand.vmem [shape: bf16[6,32,128], index: 6, kind: input, shape index: {}]   ;;  %s2651_s7 = inlined_call_operand.vmem [shape: f32[6,1,128], index: 7, kind: input, shape index: {}]   ;;  %s2652_s8 = inlined_call_operand.vmem [shape: bf16[6,128,32], index: 8, kind: input, shape index: {}]   ;;  %s2653_s9 = inlined_call_operand.vmem [shape: f32[6,1,32], index: 9, kind: input, shape index: {}]   ;;  %s2654_s10 = inlined_call_operand.vmem [shape: f32[6,1,32], index: 10, kind: input, shape index: {}]   ;;  %s2655_s11 = inlined_call_operand.vmem [shape: f32[6,1,32], index: 11, kind: input, shape index: {}]   ;;  %s2656_s12 = inlined_call_operand.vmem [shape: f32[6,1,32], index: 12, kind: input, shape index: {}]   ;;  %s2657_s13 = inlined_call_operand.vmem [shape: f32[6,1,32], index: 13, kind: input, shape index: {}]   ;;  %s2658_s14 = inlined_call_operand.vmem [shape: bf16[32,128], index: 14, kind: input, shape index: {}]   ;;  %s2659_s15 = inlined_call_operand.vmem [shape: f32[1,128], index: 15, kind: input, shape index: {}]   ;;  %s2660_s16 = inlined_call_operand.vmem [shape: f32[2,8,128], index: 16, kind: output, shape index: {}]  }
   0x1   :  { %2666 = sst [smem:[#allocation9_spill]] %s2644_s0  ;;  %s2325_s23 = smov 0  }
   0x2   :  { %2667 = sst [smem:[#allocation10_spill]] %s2645_s1  ;;  %s2327_s24 = smov 0  }
   0x3   :  { %2668 = sst [smem:[#allocation11_spill]] %s2646_s2  ;;  %s2329_s25 = smov 0  }
   0x4   :  { %2669 = sst [smem:[#allocation12_spill]] %s2647_s3 }
   0x5   :  { %2670 = sst [smem:[#allocation13_spill]] %s2648_s4 }
   0x6   :  { %2671 = sst [smem:[#allocation14_spill]] %s2650_s6 }
   0x7   :  { %2672 = sst [smem:[#allocation15_spill]] %s2651_s7 }
   0x8   :  { %2673 = sst [smem:[#allocation16_spill]] %s2652_s8 }
   0x9   :  { %2674 = sst [smem:[#allocation17_spill]] %s2653_s9 }
   0xa   :  { %2675 = sst [smem:[#allocation18_spill]] %s2656_s12 }
   0xb   :  { %2676 = sst [smem:[#allocation19_spill]] %s2657_s13 }
   0xc   :  { %2677 = sst [smem:[#allocation20_spill]] %s2658_s14 }
   0xd   :  { %2678 = sst [smem:[#allocation21_spill]] %s2659_s15 }
   0xe   :  { %2679 = sst [smem:[#allocation22_spill]] %s2660_s16 }
   0xf LB: > { %2680 = sst [smem:[#allocation3_spill]] %s2194_s21  ;;  %s35_s26 = sadd.s32 1, %s2202_s23  ;;  %s2210_s25 = sphi %s2329_s25, %s26_s25   ;;  %s2206_s24 = sphi %s2327_s24, %s2715_s24   ;;  %s2202_s23 = sphi %s2325_s23, %s2714_s23   ;;  %s2198_s22 = sphi %s2323_s22, %s2713_s22   ;;  %s2194_s21 = sphi %s2321_s21, %s2712_s21  }
  0x10   : > { %2681 = sst [smem:[#allocation4_spill]] %s2202_s23  ;;  %s38_s27 = sadd.s32 1, %s2206_s24 }
  0x11   : > { %2682 = sst [smem:[#allocation5_spill]] %s2206_s24  ;;  %p36_p0 = scmp.ge.s32.totalorder %s35_s26, 6 }
  0x12   : > { %2683 = sst [smem:[#allocation6_spill]] %s2210_s25  ;;  %p1936_p1 = scmp.ge.s32.totalorder %s2210_s25, 1 }
  0x13   : > { %p585_p2 = scmp.lt.s32.totalorder %s2210_s25, 13  ;;  %s2717_s26 = smov (%p36_p0, %s35_s26), 0 }
  0x14   : > { %2684 = sst [smem:[#allocation7_spill]] %s2717_s26  ;;  %s2719_s27 = smov (!%p36_p0, %s38_s27), %s2206_s24 }
  0x15   : > { %p586_p3 = pnand %p1936_p1, %p585_p2  ;;  %p40_p4 = scmp.ge.s32.totalorder %s2719_s27, 2 }
  0x16   : > { %p680_p5 = scmp.lt.s32.totalorder (!%p586_p3), %s2198_s22, 1  ;;  %p687_p6 = scmp.lt.s32.totalorder (!%p586_p3), %s2194_s21, 5 }
  0x17   : > { %s2721_s27 = smov (%p40_p4, %s2719_s27), 0  ;;  %589 = sbr.rel (%p586_p3) target bundleno = 2533 (0x9e5), region = 84 }
  0x18   : > { %2685 = sst [smem:[#allocation8_spill]] %s2721_s27 }
  0x19   : > { %s2687_s20 = sld [smem:[#allocation9_spill]] (!%p586_p3) }
  0x1a   : > { %s2688_s2 = sld [smem:[#allocation11_spill]] (!%p586_p3) }
  0x1b   : > { %s2689_s3 = sld [smem:[#allocation12_spill]] (!%p586_p3) }
  0x1c   : > { %s2723_s22 = smov (!%p680_p5, %s2198_s22), 1  ;;  %s2690_s4 = sld [smem:[#allocation13_spill]] }
  0x1d   : > { %s2357_s28 = scalar_select %p687_p6, %s2194_s21, 5 }
  0x1e   : > { %s1937_s29 = sshll.u32 %s2723_s22, 3  ;;  %s2691_s6 = sld [smem:[#allocation14_spill]] }
  0x1f   : > { %s683_s27 = scalar_lea.vmem %s2687_s20, %s1937_s29  ;;  %s2042_s26 = sshll.u32 %s2357_s28, 4 }
  0x20   : > { %s691_s25 = scalar_lea.vmem %s2688_s2, %s2042_s26  ;;  %s2045_s14 = sshll.u32 %s2357_s28, 6 }
  0x21   : > { %s694_s21 = scalar_lea.vmem %s2689_s3, %s2357_s28  ;;  %s2694_s8 = sld [smem:[#allocation16_spill]] }
  0x22   : > { %s2378_s12 = scalar_lea.vmem %s2690_s4, %s2042_s26  ;;  %s721_s18 = scalar_lea.vmem %s2654_s10, %s2357_s28 }
  0x23   : > { %s724_s17 = scalar_lea.vmem %s2655_s11, %s2357_s28  ;;  %s2695_s2 = sld [smem:[#allocation18_spill]] }
  0x24   : > { %s2387_s20 = scalar_lea.vmem %s2691_s6, %s2042_s26  ;;  %s2696_s15 = sld [smem:[#allocation19_spill]] }
  0x27   : > { %s2401_s1 = scalar_lea.vmem %s2694_s8, %s2045_s14  ;;  %s2697_s14 = sld [smem:[#allocation22_spill]] }
  0x28   : > { %s2698_s8 = sld [smem:[#allocation3_spill]] }
  0x29   : > { %s727_s6 = scalar_lea.vmem %s2695_s2, %s2357_s28 }
  0x2a   : > { %s730_s13 = scalar_lea.vmem %s2696_s15, %s2357_s28 }
  0x2d   : > { %s2422_s16 = scalar_lea.vmem %s2697_s14, %s1937_s29 }
  0x2e   : > { %p1947_p7 = scmp.ne.s32.totalorder %s2698_s8, 0 }
  0x30   : > { %739 = sbr.rel (%p1947_p7) target bundleno = 55 (0x37), region = 88 }
  0x35   : > { %v740_v0 = vld [vmem:[%s683_s27] sm:$0xff]  ;;  %vm741_vm0 = vcmask 261120  }
  0x36   : > { %742 = vst.msk [vmem:[#allocation2] sm:$0xff] %vm741_vm0, %v740_v0 }
  0x37 PF: > { %v2047_v1 = vld [vmem:[%s691_s25 + $0x8] sm:$0xff]  ;;  %v2046_v2 = vld [vmem:[%s691_s25] sm:$0xff]  ;;  %vm765_vm1 = vcmask 261120   ;;  %s2212_s2 = smov 96   ;;  %s2213_s7 = smov 92   ;;  %vm928_vm2 = vcmask 1041408  }
  0x38   : > { %775 = vmatpush.bf16.msra.mxu0 %v2047_v1  ;;  %v2124_v5 = vld [vmem:[%s694_s21] ss:$0 sm:$0xff]  ;;  %s2214_s8 = smov 60   ;;  %s2215_s9 = smov 124   ;;  %v920_v9 = vld [vmem:[%s2378_s12] sm:$0xc] }
  0x39   : > { %s2216_s25 = smov 84   ;;  %s2217_s21 = smov 88   ;;  %v922_v10 = vunpack.c.l.b16 %v920_v9  ;;  %vm789_vm3 = vcmask 31744   ;;  %vm814_vm4 = vcmask 64512   ;;  %v853_v54 = vld [vmem:[%s2378_s12] sm:$0x3] }
  0x3a   : > { %s2218_s27 = smov 80   ;;  %s2219_s29 = smov 116   ;;  %v949_v55 = vsel %vm928_vm2, %v853_v54, 0 }
  0x3b   : > { %s2220_s30 = smov 112   ;;  %s2221_s0 = smov 76   ;;  %v923_v11 = vpack.c.b16 %v922_v10, %v922_v10 }
  0x3c   : > { %776 = vmatpush.bf16.msra.mxu0 %v2046_v2  ;;  %s2222_s26 = smov 72   ;;  %s2223_s19 = smov 104  }
  0x3d   : > { %v2425_v3 = vld [vmem:[#allocation2] sm:$0xff]  ;;  %s2224_s23 = smov 68   ;;  %s2225_s24 = smov 100   ;;  %v924_v12 = vrot.slane %v923_v11, 2 }
  0x3e   : > { %v744_v4 = vpack.c.bf16 %v2425_v3, %v2425_v3  ;;  %s2226_s3 = smov 64   ;;  %s2227_s15 = smov 56  }
  0x3f   : > { %v930_v13 = vsel %vm928_vm2, %v924_v12, 0  ;;  %s2704_s14 = sld [smem:[#allocation17_spill]] }
  0x40   : > { %1956 = vmatmul.msk.bf16.vlgmr.msra.gmra.mxu0 %vm765_vm1, %v744_v4 }
  0xbd   : > { %v778_v6 = vpop.f32.mrf.mxu0 }
  0xbe   : > { %v2430_v7 = vadd.f32 %v2124_v5, %v778_v6 }
  0xc0   : > { %787 = vrot.lane.b32.xlu2 %v2430_v7, %s2212_s2  ;;  %856 = vrot.lane.b32.xlu0 %v2430_v7, %s2213_s7  ;;  %s2699_s2 = sld [smem:[#allocation10_spill]] }
  0xc5   : > { %v780_v8 = vpop.f32.mrf.mxu0 }
  0xc6   : > { %s2700_s7 = scalar_lea.vmem %s2699_s2, %s2723_s22  ;;  %s2228_s22 = smov 120  }
  0xc7   : > { %v2476_v29 = vld [vmem:[%s2700_s7] ss:$0 sm:$0xff]  ;;  %s2705_s2 = scalar_lea.vmem %s2704_s14, %s2357_s28 }
  0xc8   : > { %893 = vrot.lane.b32.xlu2 %v2430_v7, %s2214_s8  ;;  %854 = vrot.lane.b32.xlu0 %v2430_v7, %s2215_s9  ;;  %s2229_s8 = smov 108   ;;  %s2230_s9 = smov 44  }
  0xd0   : > { %1053 = vrot.lane.b32.xlu2 %v2430_v7, %s2216_s25  ;;  %966 = vrot.lane.b32.xlu0 %v2430_v7, %s2217_s21  ;;  %s2231_s25 = smov 40   ;;  %s2232_s21 = smov 36  }
  0xd8   : > { %1144 = vrot.lane.b32.xlu2 %v2430_v7, %s2218_s27  ;;  %1051 = vrot.lane.b32.xlu0 %v2430_v7, %s2219_s29  ;;  %s2233_s27 = smov 52   ;;  %s2234_s29 = smov 48  }
  0xe0   : > { %1142 = vrot.lane.b32.xlu2 %v2430_v7, %s2220_s30 }
  0xe8   : > { %1231 = vrot.lane.b32.xlu2 %v2430_v7, %s2221_s0  ;;  %s2701_s0 = scalar_lea.vmem %s2649_s5, %s2357_s28 }
  0xf0   : > { %1322 = vrot.lane.b32.xlu2 %v2430_v7, %s2222_s26 }
  0xf8   : > { %1320 = vrot.lane.b32.xlu2 %v2430_v7, %s2223_s19 }
 0x100   : > { %1409 = vrot.lane.b32.xlu2 %v2430_v7, %s2224_s23 }
 0x108   : > { %1407 = vrot.lane.b32.xlu2 %v2430_v7, %s2225_s24 }
 0x110   : > { %826 = vrot.lane.b32.xlu2 %v2430_v7, %s2226_s3  ;;  %s2702_s3 = sld [smem:[#allocation15_spill]] }
 0x118   : > { %1003 = vrot.lane.b32.xlu2 %v2430_v7, %s2227_s15  ;;  %s2703_s15 = scalar_lea.vmem %s2702_s3, %s2357_s28 }
 0x11a   : > { %v788_v14 = vpop.permute.xlu2 %787 }
 0x11b   : > { %1957 = vmatpush.xpose.msk.msra.mxu1 %vm789_vm3, %v788_v14 }
 0x11e   : > { %1958 = vmatmul.msk.f32.vlgmr.msra.gmra.mxu1 %vm789_vm3, %v2430_v7 }
 0x11f   : > { %939 = vmatpush.bf16.msrb.mxu1 %v930_v13 }
 0x122   : > { %v894_v15 = vpop.permute.xlu2 %893 }
 0x123   : > { %914 = vmatpush.msra.mxu2 %v894_v15 }
 0x12a   : > { %v1054_v16 = vpop.permute.xlu2 %1053 }
 0x12b   : > { %1969 = vmatpush.xpose.msk.msra.mxu1 %vm789_vm3, %v1054_v16 }
 0x132   : > { %v2454_v17 = vpop.permute.xlu2 %1144  ;;  %v857_v18 = vpop.permute.xlu0 %856 }
 0x133   : > { %1960 = vmatpush.xpose.msk.msra.mxu3 %vm789_vm3, %v857_v18 }
 0x137   : > { %958 = vmatpush.bf16.msrb.mxu3 %v949_v55  ;;  %v1030_v55 = vld [vmem:[%s2378_s12 + $0x4] sm:$0x3] }
 0x13a   : > { %v2457_v19 = vpop.permute.xlu2 %1142  ;;  %v855_v20 = vpop.permute.xlu0 %854 }
 0x13b   : > { %1961 = vmatmul.msk.f32.vlgmr.msra.gmra.mxu3 %vm789_vm3, %v855_v20 }
 0x142   : > { %v2460_v21 = vpop.permute.xlu2 %1231  ;;  %v967_v22 = vpop.permute.xlu0 %966 }
 0x143   : > { %1965 = vmatpush.xpose.msk.msrb.mxu2 %vm789_vm3, %v967_v22 }
 0x14a   : > { %v2463_v23 = vpop.permute.xlu2 %1322  ;;  %v1052_v36 = vpop.permute.xlu0 %1051 }
 0x152   : > { %v2465_v24 = vpop.permute.xlu2 %1320 }
 0x15a   : > { %v2467_v25 = vpop.permute.xlu2 %1409 }
 0x162   : > { %v2469_v26 = vpop.permute.xlu2 %1407 }
 0x16a   : > { %v827_v27 = vpop.permute.xlu2 %826 }
 0x16b   : > { %847 = vmatpush.msrb.mxu0 %v827_v27 }
 0x172   : > { %v1004_v28 = vpop.permute.xlu2 %1003 }
 0x173   : > { %1024 = vmatpush.msra.mxu0 %v1004_v28 }
 0x19b   : > { %v811_v30 = vpop.f32.mrf.mxu1 }
 0x19c   : > { %v812_v31 = vadd.f32 %v2476_v29, %v811_v30 }
 0x19e   : > { %v815_v32 = vsel %vm814_vm4, %v812_v31, -inf }
 0x19f   : > { %816 = vmax.xlane.f32.xlu0 %v815_v32 }
 0x1be   : > { %v879_v33 = vpop.f32.mrf.mxu3 }
 0x1bf   : > { %v880_v34 = vadd.f32 %v2476_v29, %v879_v33 }
 0x1c1   : > { %v882_v35 = vsel %vm814_vm4, %v880_v34, -inf }
 0x1c2   : > { %883 = vmax.xlane.f32.xlu1 %v882_v35 }
 0x212   : > { %v817_v37 = vpop.xlane.xlu0 %816 }
 0x213   : > { %v818_v38 = vsub.f32 %v812_v31, %v817_v37 }
 0x215   : > { %v819_v39 = vmul.f32 1.442695, %v818_v38 }
 0x217   : > { %2133 = vpow2.f32 %v819_v39 }
 0x21d   : > { %v2134_v40 = vpop.eup %2133 }
 0x21e   : > { %v821_v41 = vsel %vm814_vm4, %v2134_v40, 0.0 }
 0x21f   : > { %822 = vadd.xlane.f32.xlu0 %v821_v41 }
 0x235   : > { %v884_v42 = vpop.xlane.xlu1 %883 }
 0x236   : > { %v885_v43 = vsub.f32 %v880_v34, %v884_v42 }
 0x238   : > { %v886_v44 = vmul.f32 1.442695, %v885_v43 }
 0x23a   : > { %2135 = vpow2.f32 %v886_v44 }
 0x240   : > { %v2136_v45 = vpop.eup %2135 }
 0x241   : > { %v888_v46 = vsel %vm814_vm4, %v2136_v45, 0.0 }
 0x242   : > { %889 = vadd.xlane.f32.xlu1 %v888_v46 }
 0x25b   : > { %964 = vrot.lane.b32.xlu1 %v2430_v7, %s2228_s22 }
 0x263   : > { %1229 = vrot.lane.b32.xlu1 %v2430_v7, %s2229_s8 }
 0x292   : > { %v823_v47 = vpop.xlane.xlu0 %822 }
 0x293   : > { %2137 = vrcp.f32 %v823_v47 }
 0x299   : > { %v2138_v48 = vpop.eup %2137 }
 0x29a   : > { %v825_v49 = vmul.f32 %v2138_v48, %v2134_v40 }
 0x29c   : > { %1959 = vmatmul.msk.f32.vlgmr.msrb.gmra.mxu0 %vm814_vm4, %v825_v49 }
 0x2b5   : > { %v890_v50 = vpop.xlane.xlu1 %889 }
 0x2b6   : > { %2139 = vrcp.f32 %v890_v50 }
 0x2bc   : > { %v2140_v51 = vpop.eup %2139 }
 0x2bd   : > { %v892_v52 = vmul.f32 %v2140_v51, %v2136_v45 }
 0x2bf   : > { %1962 = vmatmul.msk.f32.vlgmr.msra.gmra.mxu2 %vm814_vm4, %v892_v52 }
 0x2cd   : > { %v965_v53 = vpop.permute.xlu1 %964 }
 0x2ce   : > { %1966 = vmatmul.msk.f32.vlgmr.msrb.gmra.mxu2 %vm789_vm3, %v965_v53 }
 0x2d5   : > { %v1230_v63 = vpop.permute.xlu1 %1229 }
 0x319   : > { %v849_v56 = vpop.f32.mrf.mxu0 }
 0x31a   : > { %v852_v57 = vpack.c.bf16 %v849_v56, %v849_v56  ;;  %v1035_v56 = vsel %vm928_vm2, %v1030_v55, 0 }
 0x31b   : > { %1044 = vmatpush.bf16.msra.mxu3 %v1035_v56 }
 0x31c   : > { %1964 = vmatmul.msk.bf16.vlgmr.msrb.gmra.mxu3 %vm789_vm3, %v852_v57 }
 0x342   : > { %v916_v58 = vpop.f32.mrf.mxu2 }
 0x343   : > { %v919_v59 = vpack.c.bf16 %v916_v58, %v916_v58 }
 0x345   : > { %1963 = vmatmul.msk.bf16.vlgmr.msrb.gmra.mxu1 %vm789_vm3, %v919_v59 }
 0x346   : > { %1973 = vmatpush.xpose.msk.msrb.mxu1 %vm789_vm3, %v2454_v17 }
 0x351   : > { %v989_v60 = vpop.f32.mrf.mxu2 }
 0x352   : > { %v990_v61 = vadd.f32 %v2476_v29, %v989_v60 }
 0x354   : > { %v992_v62 = vsel %vm814_vm4, %v990_v61, -inf }
 0x355   : > { %993 = vmax.xlane.f32.xlu1 %v992_v62  ;;  %1970 = vmatmul.msk.f32.vlgmr.msra.gmra.mxu1 %vm789_vm3, %v1052_v36 }
 0x356   : > { %1977 = vmatpush.xpose.msk.msra.mxu1 %vm789_vm3, %v2460_v21 }
 0x35d   : > { %1974 = vmatmul.msk.f32.vlgmr.msrb.gmra.mxu1 %vm789_vm3, %v2457_v19 }
 0x35e   : > { %1981 = vmatpush.xpose.msk.msrb.mxu1 %vm789_vm3, %v2463_v23 }
 0x365   : > { %1978 = vmatmul.msk.f32.vlgmr.msra.gmra.mxu1 %vm789_vm3, %v1230_v63 }
 0x366   : > { %1985 = vmatpush.xpose.msk.msra.mxu1 %vm789_vm3, %v2467_v25 }
 0x36d   : > { %1982 = vmatmul.msk.f32.vlgmr.msrb.gmra.mxu1 %vm789_vm3, %v2465_v24 }
 0x375   : > { %1986 = vmatmul.msk.f32.vlgmr.msra.gmra.mxu1 %vm789_vm3, %v2469_v26 }
 0x39f   : > { %v960_v0 = vpop.f32.mrf.mxu3 }
 0x3a7   : > { %v962_v1 = vpop.f32.mrf.mxu3 }
 0x3c2   : > { %v941_v2 = vpop.f32.mrf.mxu1 }
 0x3c3   : > { %v2511_v4 = vadd.f32 %v960_v0, %v941_v2 }
 0x3c8   : > { %v994_v5 = vpop.xlane.xlu1 %993 }
 0x3c9   : > { %v995_v6 = vsub.f32 %v990_v61, %v994_v5 }
 0x3ca   : > { %v943_v8 = vpop.f32.mrf.mxu1 }
 0x3cb   : > { %v996_v9 = vmul.f32 1.442695, %v995_v6 }
 0x3cd   : > { %2141 = vpow2.f32 %v996_v9 }
 0x3d2   : > { %v1076_v10 = vpop.f32.mrf.mxu1 }
 0x3d3   : > { %v2142_v11 = vpop.eup %2141  ;;  %v1077_v13 = vadd.f32 %v2476_v29, %v1076_v10 }
 0x3d4   : > { %v998_v12 = vsel %vm814_vm4, %v2142_v11, 0.0 }
 0x3d5   : > { %999 = vadd.xlane.f32.xlu0 %v998_v12  ;;  %v1079_v16 = vsel %vm814_vm4, %v1077_v13, -inf }
 0x3da   : > { %v1167_v14 = vpop.f32.mrf.mxu1 }
 0x3db   : > { %v1168_v15 = vadd.f32 %v2476_v29, %v1167_v14 }
 0x3dd   : > { %1080 = vmax.xlane.f32.xlu0 %v1079_v16  ;;  %v1170_v17 = vsel %vm814_vm4, %v1168_v15, -inf }
 0x3de   : > { %1171 = vmax.xlane.f32.xlu1 %v1170_v17  ;;  %v1117_v17 = vld [vmem:[%s2378_s12 + $0x4] sm:$0xc] }
 0x3e2   : > { %v1254_v18 = vpop.f32.mrf.mxu1 }
 0x3e3   : > { %v1255_v19 = vadd.f32 %v2476_v29, %v1254_v18  ;;  %v1119_v18 = vunpack.c.l.b16 %v1117_v17  ;;  %v2048_v17 = vld [vmem:[%s2387_s20] sm:$0xff] }
 0x3e5   : > { %v1257_v20 = vsel %vm814_vm4, %v1255_v19, -inf }
 0x3e6   : > { %1258 = vmax.xlane.f32.xlu2 %v1257_v20 }
 0x3ea   : > { %v1345_v21 = vpop.f32.mrf.mxu1 }
 0x3eb   : > { %v1346_v22 = vadd.f32 %v2476_v29, %v1345_v21 }
 0x3ed   : > { %v1348_v23 = vsel %vm814_vm4, %v1346_v22, -inf }
 0x3ee   : > { %1349 = vmax.xlane.f32.xlu0 %v1348_v23  ;;  %v1208_v23 = vld [vmem:[%s2378_s12 + $0x8] sm:$0x3] }
 0x3f2   : > { %v1432_v24 = vpop.f32.mrf.mxu1 }
 0x3f3   : > { %v1433_v25 = vadd.f32 %v2476_v29, %v1432_v24 }
 0x3f5   : > { %v1435_v26 = vsel %vm814_vm4, %v1433_v25, -inf }
 0x3f6   : > { %1436 = vmax.xlane.f32.xlu1 %v1435_v26  ;;  %v1295_v26 = vld [vmem:[%s2378_s12 + $0x8] sm:$0xc] }
 0x3fe   : > { %1268 = vrot.lane.b32.xlu2 %v2430_v7, %s2230_s9 }
 0x406   : > { %1359 = vrot.lane.b32.xlu2 %v2430_v7, %s2231_s25 }
 0x40e   : > { %1446 = vrot.lane.b32.xlu2 %v2430_v7, %s2232_s21  ;;  %s2708_s21 = sld [smem:[#allocation3_spill]] }
 0x414   : > { %p2030_p8 = scmp.ne.s32.totalorder %s2708_s21, 5 }
 0x448   : > { %v1000_v27 = vpop.xlane.xlu0 %999 }
 0x449   : > { %2143 = vrcp.f32 %v1000_v27  ;;  %v1297_v27 = vunpack.c.l.b16 %v1295_v26 }
 0x44f   : > { %v2144_v28 = vpop.eup %2143 }
 0x450   : > { %v1002_v30 = vmul.f32 %v2144_v28, %v2142_v11  ;;  %v1081_v31 = vpop.xlane.xlu0 %1080  ;;  %v1298_v28 = vpack.c.b16 %v1297_v27, %v1297_v27  ;;  %v2053_v27 = vld [vmem:[%s2401_s1 + $0x18] sm:$0xff] }
 0x451   : > { %v1082_v32 = vsub.f32 %v1077_v13, %v1081_v31  ;;  %v1172_v33 = vpop.xlane.xlu1 %1171 }
 0x452   : > { %v1173_v29 = vsub.f32 %v1168_v15, %v1172_v33  ;;  %1967 = vmatmul.msk.f32.vlgmr.msra.gmra.mxu0 %vm814_vm4, %v1002_v30  ;;  %v1299_v30 = vrot.slane %v1298_v28, 2  ;;  %v1386_v33 = vld [vmem:[%s2378_s12 + $0xc] sm:$0x3] }
 0x453   : > { %v1083_v34 = vmul.f32 1.442695, %v1082_v32 }
 0x454   : > { %v1174_v35 = vmul.f32 1.442695, %v1173_v29  ;;  %v1304_v32 = vsel %vm928_vm2, %v1299_v30, 0  ;;  %v1391_v29 = vsel %vm928_vm2, %v1386_v33, 0 }
 0x455   : > { %2145 = vpow2.f32 %v1083_v34 }
 0x456   : > { %2147 = vpow2.f32 %v1174_v35 }
 0x459   : > { %v1259_v36 = vpop.xlane.xlu2 %1258 }
 0x45a   : > { %v1260_v37 = vsub.f32 %v1255_v19, %v1259_v36  ;;  %v1120_v19 = vpack.c.b16 %v1119_v18, %v1119_v18  ;;  %v2057_v18 = vld [vmem:[%s2401_s1 + $0x38] sm:$0xff] }
 0x45b   : > { %v2146_v38 = vpop.eup %2145 }
 0x45c   : > { %v2148_v39 = vpop.eup %2147  ;;  %v1261_v40 = vmul.f32 1.442695, %v1260_v37  ;;  %v1085_v41 = vsel %vm814_vm4, %v2146_v38, 0.0  ;;  %v1121_v20 = vrot.slane %v1120_v19, 2  ;;  %v1473_v37 = vld [vmem:[%s2378_s12 + $0xc] sm:$0xc] }
 0x45d   : > { %1086 = vadd.xlane.f32.xlu0 %v1085_v41  ;;  %v1176_v42 = vsel %vm814_vm4, %v2148_v39, 0.0  ;;  %s2709_s12 = sld [smem:[#allocation20_spill]] (!%p2030_p8) }
 0x45e   : > { %2149 = vpow2.f32 %v1261_v40  ;;  %1177 = vadd.xlane.f32.xlu1 %v1176_v42  ;;  %v1126_v21 = vsel %vm928_vm2, %v1121_v20, 0 }
 0x45f   : > { %1135 = vmatpush.bf16.msrb.mxu0 %v1126_v21  ;;  %v2056_v21 = vld [vmem:[%s2401_s1 + $0x30] sm:$0xff] }
 0x461   : > { %v1350_v45 = vpop.xlane.xlu0 %1349  ;;  %v1269_v63 = vpop.permute.xlu2 %1268 }
 0x462   : > { %v1351_v46 = vsub.f32 %v1346_v22, %v1350_v45 }
 0x463   : > { %1313 = vmatpush.bf16.msra.mxu0 %v1304_v32 }
 0x464   : > { %v2150_v43 = vpop.eup %2149  ;;  %v1352_v47 = vmul.f32 1.442695, %v1351_v46 }
 0x465   : > { %v1263_v44 = vsel %vm814_vm4, %v2150_v43, 0.0 }
 0x466   : > { %1264 = vadd.xlane.f32.xlu1 %v1263_v44  ;;  %2151 = vpow2.f32 %v1352_v47 }
 0x469   : > { %v1437_v48 = vpop.xlane.xlu1 %1436  ;;  %v1360_v2 = vpop.permute.xlu2 %1359 }
 0x46a   : > { %v1438_v50 = vsub.f32 %v1433_v25, %v1437_v48  ;;  %v1213_v25 = vsel %vm928_vm2, %v1208_v23, 0  ;;  %v2055_v23 = vld [vmem:[%s2401_s1 + $0x28] sm:$0xff] }
 0x46b   : > { %1222 = vmatpush.bf16.msra.mxu2 %v1213_v25 }
 0x46c   : > { %v2152_v49 = vpop.eup %2151  ;;  %v1439_v52 = vmul.f32 1.442695, %v1438_v50 }
 0x46d   : > { %v1354_v51 = vsel %vm814_vm4, %v2152_v49, 0.0 }
 0x46e   : > { %2153 = vpow2.f32 %v1439_v52 }
 0x46f   : > { %1400 = vmatpush.bf16.msrb.mxu2 %v1391_v29  ;;  %v2127_v29 = vld [vmem:[%s721_s18] ss:$0 sm:$0xff] }
 0x471   : > { %1090 = vrot.lane.b32.xlu0 %v2430_v7, %s2233_s27  ;;  %v1447_v10 = vpop.permute.xlu2 %1446 }
 0x474   : > { %v2154_v53 = vpop.eup %2153 }
 0x475   : > { %v1441_v54 = vsel %vm814_vm4, %v2154_v53, 0.0 }
 0x47f   : > { %1181 = vrot.lane.b32.xlu1 %v2430_v7, %s2234_s29 }
 0x49b   : > { %1355 = vadd.xlane.f32.xlu0 %v1354_v51 }
 0x4a9   : > { %1442 = vadd.xlane.f32.xlu1 %v1441_v54 }
 0x4cf   : > { %v1026_v7 = vpop.f32.mrf.mxu0 }
 0x4d0   : > { %v1029_v57 = vpack.c.bf16 %v1026_v7, %v1026_v7  ;;  %v1087_v58 = vpop.xlane.xlu0 %1086 }
 0x4d1   : > { %2155 = vrcp.f32 %v1087_v58  ;;  %v1178_v59 = vpop.xlane.xlu1 %1177  ;;  %v2126_v58 = vld [vmem:[%s2701_s0] ss:$0 sm:$0xff]  ;;  %s2710_s0 = sld [smem:[#allocation21_spill]] (!%p2030_p8) }
 0x4d2   : > { %1968 = vmatmul.msk.bf16.vlgmr.msra.gmra.mxu3 %vm789_vm3, %v1029_v57  ;;  %2157 = vrcp.f32 %v1178_v59 }
 0x4d7   : > { %v2156_v60 = vpop.eup %2155 }
 0x4d8   : > { %v1089_v61 = vmul.f32 %v2156_v60, %v2146_v38  ;;  %v2158_v1 = vpop.eup %2157  ;;  %v1475_v38 = vunpack.c.l.b16 %v1473_v37 }
 0x4d9   : > { %v1265_v0 = vpop.xlane.xlu1 %1264  ;;  %v1180_v5 = vmul.f32 %v2158_v1, %v2148_v39 }
 0x4da   : > { %2159 = vrcp.f32 %v1265_v0  ;;  %v1476_v41 = vpack.c.b16 %v1475_v38, %v1475_v38 }
 0x4dc   : > { %v1477_v42 = vrot.slane %v1476_v41, 2  ;;  %v2129_v41 = vld [vmem:[%s2703_s15] ss:$0 sm:$0xff] }
 0x4e0   : > { %v2160_v8 = vpop.eup %2159 }
 0x4e1   : > { %v1267_v9 = vmul.f32 %v2160_v8, %v2150_v43  ;;  %v1482_v43 = vsel %vm928_vm2, %v1477_v42, 0 }
 0x4e3   : > { %v1091_v62 = vpop.permute.xlu0 %1090 }
 0x4e4   : > { %1111 = vmatpush.msrb.mxu3 %v1091_v62 }
 0x4e5   : > { %1971 = vmatmul.msk.f32.vlgmr.msrb.gmra.mxu3 %vm814_vm4, %v1089_v61 }
 0x4f1   : > { %v1182_v6 = vpop.permute.xlu1 %1181 }
 0x4f2   : > { %1202 = vmatpush.msra.mxu3 %v1182_v6 }
 0x4f3   : > { %1975 = vmatmul.msk.f32.vlgmr.msra.gmra.mxu3 %vm814_vm4, %v1180_v5 }
 0x4f4   : > { %1289 = vmatpush.msrb.mxu3 %v1269_v63 }
 0x4f6   : > { %1380 = vmatpush.msra.mxu3 %v1360_v2  ;;  %v2235_v2 = vmov 32.0  }
 0x4fb   : > { %1979 = vmatmul.msk.f32.vlgmr.msrb.gmra.mxu3 %vm814_vm4, %v1267_v9 }
 0x4fc   : > { %1467 = vmatpush.msrb.mxu3 %v1447_v10 }
 0x50e   : > { %v1356_v11 = vpop.xlane.xlu0 %1355 }
 0x50f   : > { %2161 = vrcp.f32 %v1356_v11 }
 0x515   : > { %v2162_v12 = vpop.eup %2161 }
 0x516   : > { %v1358_v13 = vmul.f32 %v2162_v12, %v2152_v49 }
 0x518   : > { %1983 = vmatmul.msk.f32.vlgmr.msra.gmra.mxu3 %vm814_vm4, %v1358_v13 }
 0x51c   : > { %v1443_v14 = vpop.xlane.xlu1 %1442 }
 0x51d   : > { %2163 = vrcp.f32 %v1443_v14 }
 0x51e   : > { %2165 = vrcp.f32 %v2235_v2  ;;  %v2131_v2 = vld [vmem:[%s727_s6] ss:$0 sm:$0xff] }
 0x523   : > { %v2164_v15 = vpop.eup %2163 }
 0x524   : > { %v1445_v16 = vmul.f32 %v2164_v15, %v2154_v53  ;;  %v2166_v5 = vpop.eup %2165 }
 0x525   : > { %v1508_v6 = vmul.f32 32.0, %v2166_v5  ;;  %vm1512_vm5 = vweird.f32 %v2166_v5 }
 0x526   : > { %1987 = vmatmul.msk.f32.vlgmr.msrb.gmra.mxu3 %vm814_vm4, %v1445_v16  ;;  %v2049_v16 = vld [vmem:[%s2387_s20 + $0x8] sm:$0xff] }
 0x527   : > { %v1509_v8 = vsub.f32 1.0, %v1508_v6  ;;  %1573 = vmatpush.bf16.msrb.mxu1 %v2049_v16  ;;  %v2132_v6 = vld [vmem:[%s730_s13] ss:$0 sm:$0xff] }
 0x529   : > { %v1510_v9 = vmul.f32 %v2166_v5, %v1509_v8 }
 0x52b   : > { %v1511_v10 = vadd.f32 %v2166_v5, %v1510_v9  ;;  %1574 = vmatpush.bf16.msrb.mxu1 %v2048_v17 }
 0x52d   : > { %v2566_v11 = vsel %vm1512_vm5, %v2166_v5, %v1511_v10 }
 0x555   : > { %v1046_v22 = vpop.f32.mrf.mxu3 }
 0x556   : > { %v1050_v24 = vadd.f32 %v1046_v22, %v2511_v4 }
 0x55d   : > { %v1048_v31 = vpop.f32.mrf.mxu3 }
 0x55e   : > { %v2052_v31 = vld [vmem:[%s2401_s1 + $0x10] sm:$0xff] }
 0x568   : > { %v1113_v34 = vpop.f32.mrf.mxu3 }
 0x569   : > { %v1116_v35 = vpack.c.bf16 %v1113_v34, %v1113_v34 }
 0x56b   : > { %1972 = vmatmul.msk.bf16.vlgmr.msrb.gmra.mxu0 %vm789_vm3, %v1116_v35  ;;  %v2128_v35 = vld [vmem:[%s724_s17] ss:$0 sm:$0xff] }
 0x56c   : > { %1491 = vmatpush.bf16.msrb.mxu0 %v1482_v43 }
 0x576   : > { %v1204_v4 = vpop.f32.mrf.mxu3 }
 0x577   : > { %v1207_v36 = vpack.c.bf16 %v1204_v4, %v1204_v4 }
 0x579   : > { %1976 = vmatmul.msk.bf16.vlgmr.msra.gmra.mxu2 %vm789_vm3, %v1207_v36 }
 0x57a   : > { %1650 = vmatpush.bf16.msra.mxu2 %v2057_v18 }
 0x57e   : > { %v1291_v39 = vpop.f32.mrf.mxu3  ;;  %1651 = vmatpush.bf16.msra.mxu2 %v2056_v21 }
 0x57f   : > { %v1294_v40 = vpack.c.bf16 %v1291_v39, %v1291_v39  ;;  %v2051_v39 = vld [vmem:[%s2401_s1 + $0x8] sm:$0xff] }
 0x581   : > { %1980 = vmatmul.msk.bf16.vlgmr.msra.gmra.mxu0 %vm789_vm3, %v1294_v40  ;;  %v2050_v40 = vld [vmem:[%s2401_s1] sm:$0xff] }
 0x582   : > { %1652 = vmatpush.bf16.msra.mxu2 %v2055_v23 }
 0x59b   : > { %v1382_v44 = vpop.f32.mrf.mxu3 }
 0x59c   : > { %v1385_v45 = vpack.c.bf16 %v1382_v44, %v1382_v44 }
 0x59e   : > { %1984 = vmatmul.msk.bf16.vlgmr.msrb.gmra.mxu2 %vm789_vm3, %v1385_v45 }
 0x5a9   : > { %v1469_v46 = vpop.f32.mrf.mxu3 }
 0x5aa   : > { %v1472_v47 = vpack.c.bf16 %v1469_v46, %v1469_v46 }
 0x5ac   : > { %1988 = vmatmul.msk.bf16.vlgmr.msrb.gmra.mxu0 %vm789_vm3, %v1472_v47  ;;  %v2130_v47 = vld [vmem:[%s2705_s2] ss:$0 sm:$0xff] }
 0x5e8   : > { %v1137_v48 = vpop.f32.mrf.mxu0 }
 0x5e9   : > { %v1141_v54 = vadd.f32 %v1137_v48, %v1050_v24  ;;  %v2054_v24 = vld [vmem:[%s2401_s1 + $0x20] sm:$0xff] }
 0x5ea   : > { %1653 = vmatpush.bf16.msra.mxu2 %v2054_v24 }
 0x5ee   : > { %1654 = vmatpush.bf16.msra.mxu2 %v2053_v27 }
 0x5f0   : > { %v1139_v49 = vpop.f32.mrf.mxu0 }
 0x5f2   : > { %1655 = vmatpush.bf16.msra.mxu2 %v2052_v31 }
 0x5f6   : > { %1656 = vmatpush.bf16.msra.mxu2 %v2051_v39 }
 0x5fa   : > { %1657 = vmatpush.bf16.msra.mxu2 %v2050_v40 }
 0x5fc   : > { %v1224_v50 = vpop.f32.mrf.mxu2 }
 0x5fd   : > { %v1228_v56 = vadd.f32 %v1224_v50, %v1141_v54 }
 0x5fe   : > { %v1315_v51 = vpop.f32.mrf.mxu0 }
 0x5ff   : > { %v1319_v7 = vadd.f32 %v1315_v51, %v1228_v56 }
 0x604   : > { %v1226_v52 = vpop.f32.mrf.mxu2 }
 0x606   : > { %v1317_v53 = vpop.f32.mrf.mxu0 }
 0x621   : > { %v1402_v55 = vpop.f32.mrf.mxu2 }
 0x622   : > { %v1406_v57 = vadd.f32 %v1402_v55, %v1319_v7 }
 0x629   : > { %v1404_v59 = vpop.f32.mrf.mxu2  ;;  %v1493_v60 = vpop.f32.mrf.mxu0 }
 0x62a   : > { %v1497_v61 = vadd.f32 %v1493_v60, %v1406_v57 }
 0x62c   : > { %v1502_v62 = vadd.f32 %v2126_v58, %v1497_v61 }
 0x62e   : > { %v1503_v63 = vadd.f32 %v1502_v62, %v2425_v3 }
 0x630   : > { %v1504_v0 = vsel %vm765_vm1, %v1503_v63, 0.0 }
 0x631   : > { %v1495_v1 = vpop.f32.mrf.mxu0  ;;  %1505 = vadd.xlane.f32.xlu0 %v1504_v0 }
 0x6a4   : > { %v1506_v12 = vpop.xlane.xlu0 %1505 }
 0x6a5   : > { %v1514_v3 = vmul.f32 %v2566_v11, %v1506_v12 }
 0x6a7   : > { %v1515_v13 = vsub.f32 %v1503_v63, %v1514_v3 }
 0x6a9   : > { %v1516_v14 = vmul.f32 %v1515_v13, %v1515_v13 }
 0x6ab   : > { %v1517_v15 = vsel %vm765_vm1, %v1516_v14, 0.0 }
 0x6ac   : > { %1518 = vadd.xlane.f32.xlu2 %v1517_v15 }
 0x71f   : > { %v1519_v19 = vpop.xlane.xlu2 %1518 }
 0x720   : > { %v1520_v20 = vmul.f32 %v1519_v19, %v2566_v11 }
 0x722   : > { %v1521_v22 = vadd.f32 1e-05, %v1520_v20 }
 0x724   : > { %2167 = vrsqrt.f32 %v1521_v22  ;;  %vm1528_vm7 = vweird.f32 %v1521_v22 }
 0x72a   : > { %v2168_v25 = vpop.eup %2167 }
 0x72b   : > { %v1523_v26 = vmul.f32 %v2168_v25, %v1521_v22  ;;  %vm1529_vm6 = vweird.f32 %v2168_v25 }
 0x72c   : > { %vm1530_vm8 = vmor %vm1528_vm7, %vm1529_vm6 }
 0x72d   : > { %v1524_v28 = vmul.f32 %v2168_v25, %v1523_v26 }
 0x72f   : > { %v1525_v30 = vmul.f32 0.5, %v1524_v28 }
 0x731   : > { %v1526_v32 = vsub.f32 1.5, %v1525_v30 }
 0x733   : > { %v1527_v33 = vmul.f32 %v2168_v25, %v1526_v32 }
 0x735   : > { %v1531_v34 = vsel %vm1530_vm8, %v2168_v25, %v1527_v33 }
 0x736   : > { %v1532_v4 = vmul.f32 %v1531_v34, %v1515_v13 }
 0x738   : > { %v1537_v36 = vmul.f32 %v2127_v29, %v1532_v4 }
 0x73a   : > { %v1542_v37 = vadd.f32 %v2128_v35, %v1537_v36 }
 0x73c   : > { %v1543_v38 = vpack.c.bf16 %v1542_v37, %v1542_v37 }
 0x73e   : > { %1997 = vmatmul.msk.bf16.vlgmr.msrb.gmra.mxu1 %vm765_vm1, %v1543_v38 }
 0x7bb   : > { %v1576_v42 = vpop.f32.mrf.mxu1 }
 0x7bc   : > { %v1577_v43 = vadd.f32 %v2129_v41, %v1576_v42 }
 0x7be   : > { %v1580_v44 = vmax.f32 %v1577_v43, 0.0 }
 0x7c0   : > { %v1581_v45 = vpack.c.bf16 %v1580_v44, %v1580_v44 }
 0x7c2   : > { %1658 = vmatmul.bf16.vlgmr.msra.gmra.mxu2 %v1581_v45 }
 0x7c3   : > { %v1578_v46 = vpop.f32.mrf.mxu1 }
 0x845   : > { %v1659_v48 = vpop.f32.mrf.mxu2 }
 0x846   : > { %v1660_v49 = vadd.f32 %v2130_v47, %v1659_v48 }
 0x848   : > { %v1663_v50 = vadd.f32 %v1660_v49, %v1542_v37 }
 0x84a   : > { %v1664_v51 = vsel %vm765_vm1, %v1663_v50, 0.0 }
 0x84b   : > { %1665 = vadd.xlane.f32.xlu0 %v1664_v51 }
 0x84d   : > { %v1661_v52 = vpop.f32.mrf.mxu2 }
 0x8be   : > { %v1666_v53 = vpop.xlane.xlu0 %1665 }
 0x8bf   : > { %v1667_v54 = vmul.f32 %v1666_v53, %v2566_v11 }
 0x8c1   : > { %v1668_v55 = vsub.f32 %v1663_v50, %v1667_v54 }
 0x8c3   : > { %v1669_v56 = vmul.f32 %v1668_v55, %v1668_v55 }
 0x8c5   : > { %v1670_v7 = vsel %vm765_vm1, %v1669_v56, 0.0 }
 0x8c6   : > { %1671 = vadd.xlane.f32.xlu1 %v1670_v7 }
 0x939   : > { %v1672_v57 = vpop.xlane.xlu1 %1671 }
 0x93a   : > { %v1673_v58 = vmul.f32 %v1672_v57, %v2566_v11 }
 0x93c   : > { %v1674_v59 = vadd.f32 1e-05, %v1673_v58 }
 0x93e   : > { %2169 = vrsqrt.f32 %v1674_v59  ;;  %vm1681_vm10 = vweird.f32 %v1674_v59 }
 0x944   : > { %v2170_v60 = vpop.eup %2169 }
 0x945   : > { %v1676_v61 = vmul.f32 %v2170_v60, %v1674_v59  ;;  %vm1682_vm9 = vweird.f32 %v2170_v60 }
 0x946   : > { %vm1683_vm11 = vmor %vm1681_vm10, %vm1682_vm9 }
 0x947   : > { %v1677_v62 = vmul.f32 %v2170_v60, %v1676_v61 }
 0x949   : > { %v1678_v63 = vmul.f32 0.5, %v1677_v62 }
 0x94b   : > { %v1679_v0 = vsub.f32 1.5, %v1678_v63 }
 0x94d   : > { %v1680_v1 = vmul.f32 %v2170_v60, %v1679_v0 }
 0x94f   : > { %v1684_v5 = vsel %vm1683_vm11, %v2170_v60, %v1680_v1 }
 0x950   : > { %v1685_v8 = vmul.f32 %v1684_v5, %v1668_v55 }
 0x952   : > { %v1690_v9 = vmul.f32 %v2131_v2, %v1685_v8  ;;  %1700 = sbr.rel (%p2030_p8) target bundleno = 2533 (0x9e5), region = 92 }
 0x954   : > { %v1695_v10 = vadd.f32 %v2132_v6, %v1690_v9 }
 0x956   : > { %1696 = vst.msk [vmem:[#allocation2] sm:$0xff] %vm765_vm1, %v1695_v10 }
 0x957   : > { %v2059_v11 = vld [vmem:[%s2709_s12 + $0x8] sm:$0xff]  ;;  %v2058_v12 = vld [vmem:[%s2709_s12] sm:$0xff]  ;;  %v1701_v3 = vpack.c.bf16 %v1695_v10, %v1695_v10 }
 0x958   : > { %1731 = vmatpush.bf16.msra.mxu0 %v2059_v11  ;;  %v2171_v13 = vld [vmem:[%s2710_s0] ss:$0 sm:$0xff] }
 0x95c   : > { %1732 = vmatpush.bf16.msra.mxu0 %v2058_v12 }
 0x95f   : > { %2039 = vmatmul.msk.bf16.vlgmr.msra.gmra.mxu0 %vm765_vm1, %v1701_v3 }
 0x9dc   : > { %v1734_v14 = vpop.f32.mrf.mxu0 }
 0x9dd   : > { %v1735_v15 = vadd.f32 %v2171_v13, %v1734_v14 }
 0x9df   : > { %1738 = vst [vmem:[%s2422_s16] sm:$0xff] %v1735_v15 }
 0x9e4   : > { %v1736_v16 = vpop.f32.mrf.mxu0 }
 0x9e5 PF: > { %s2711_s20 = sld [smem:[#allocation6_spill]] }
 0x9e6   : > { %s2712_s21 = sld [smem:[#allocation4_spill]] }
 0x9e7   : > { %s2713_s22 = sld [smem:[#allocation5_spill]] }
 0x9e8   : > { %s2714_s23 = sld [smem:[#allocation7_spill]] }
 0x9e9   : > { %s2715_s24 = sld [smem:[#allocation8_spill]] }
 0x9eb   : > { %s26_s25 = sadd.s32 1, %s2711_s20  }
 0x9ec   : > { %p23_p9 = scmp.ge.s32.totalorder %s26_s25, 14  }
 0x9ee   :  { %25 = sbr.rel (!%p23_p9) target bundleno = 15 (0xf), region = 161 }

</bundles_post_ra>
